<compile_context>
chip_gen: v7x
topology: tpu7x:2x2x1
jax: 0.10.0
libtpu: 0.0.40
codegen_flags: <defaults>
</compile_context>

<pallas_src>
import functools

import jax
import jax.numpy as jnp
import numpy as np
from jax.experimental import pallas as pl
from jax.experimental.pallas import tpu as pltpu


def _round_up(x, m):
    return (x + m - 1) // m * m


def _default_elementwise_dtype():
    """bf16 elementwise/transcendentals on v6e/v7x; f32 on v5e and older (no bf16 VPU/EUP)."""
    try:
        kind = jax.devices()[0].device_kind.lower()
    except Exception:
        return jnp.float32
    for old in ('v2', 'v3', 'v4', 'v5'):
        if old in kind:
            return jnp.float32
    return jnp.bfloat16


def decoder_kernel(elem_dt,
                   hidden_ref, enc_ref, xemb_ref, w2vb_ref,
                   attw1_ref, attv_ref,
                   w1c_ref, w1e_ref, b1i_ref, b1h_ref,
                   wg_ref, bgi_ref, bgh_ref,
                   fcw_ref, fcb_ref,
                   logits_ref, lse_ref, state_ref, attn_ref,
                   out_s, m_s, l_s):
    j = pl.program_id(0)
    U = attw1_ref.shape[1]

    # ---- attention + GRU stack: computed once (first vocab tile), kept in VMEM scratch ----
    @pl.when(j == 0)
    def _():
        # Bahdanau attention.  w2vb = enc @ W2 + b_att is precomputed outside (step-invariant)
        # and arrives in bf16 (half the DMA / VMEM of the largest per-token input).
        w1q = jnp.dot(hidden_ref[...].astype(jnp.bfloat16), attw1_ref[...],
                      preferred_element_type=jnp.float32)                    # (B, U) f32
        # Big (B,S,U) elementwise block in elem_dt (bf16 on v6e/v7x, f32 on v5e);
        # the score accumulation over U stays in f32.
        t = jnp.tanh(w1q.astype(elem_dt)[:, None, :] + w2vb_ref[...].astype(elem_dt))
        score = jnp.sum((t * attv_ref[...].astype(elem_dt)[None, :, :]).astype(jnp.float32),
                        axis=-1)                                             # (B, S) f32

        m = jnp.max(score, axis=-1, keepdims=True)
        e = jnp.exp(score - m)
        # Exact normalization: attention weights are consumed externally.
        attn = e / jnp.sum(e, axis=-1, keepdims=True)
        attn_ref[...] = attn

        # context[b,h] = sum_s attn[b,s] * enc[b,s,h] : bf16 x bf16 -> f32 MXU contraction,
        # no f32 upcast of enc.
        context = jnp.einsum('bqs,bsh->bqh', attn.astype(jnp.bfloat16)[:, None, :],
                             enc_ref[...], preferred_element_type=jnp.float32)[:, 0, :]

        def gru_fused(g, bh):
            # g: (B,3U) = x @ [Wr|Wz|Wn] + (b_ir|b_iz|b_in);  bh = (b_hr|b_hz|b_hn);  h0 = 0.
            r = jax.nn.sigmoid(g[:, :U] + bh[:, :U])
            z = jax.nn.sigmoid(g[:, U:2 * U] + bh[:, U:2 * U])
            n = jnp.tanh(g[:, 2 * U:] + r * bh[:, 2 * U:])
            return (1.0 - z) * n

        # GRU 1: input = [context ; embedded token], realized as a sum of two matmuls.
        g1 = (jnp.dot(context.astype(jnp.bfloat16), w1c_ref[...],
                      preferred_element_type=jnp.float32)
              + jnp.dot(xemb_ref[...], w1e_ref[...],
                        preferred_element_type=jnp.float32)
              + b1i_ref[...])
        out = gru_fused(g1, b1h_ref[...])

        # GRU 2..4 with residual connections (single step each, h0 = 0).
        h_last = out
        for i in range(3):
            gi = jnp.dot(out.astype(jnp.bfloat16), wg_ref[i],
                         preferred_element_type=jnp.float32) + bgi_ref[i]
            h_i = gru_fused(gi, bgh_ref[i])
            h_last = h_i
            out = out + h_i

        state_ref[...] = h_last                   # gru_4 hidden state
        out_s[...] = out.astype(jnp.bfloat16)     # cast ONCE; every vocab tile reads bf16
        m_s[...] = jnp.full_like(m_s, -1e30)
        l_s[...] = jnp.zeros_like(l_s)

    # ---- vocab-tiled final projection + streaming logsumexp (flash log-softmax) ----
    # Padded vocab columns carry fc_b = -1e30; the first tile always holds real columns,
    # so m_new is finite and exp(-1e30 - m_new) underflows cleanly to 0.
    logits = jnp.dot(out_s[...], fcw_ref[...],
                     preferred_element_type=jnp.float32) + fcb_ref[...]      # (B, TILE_V) f32
    logits_ref[...] = logits.astype(logits_ref.dtype)                        # bf16 writeback

    m_old = m_s[...]
    m_new = jnp.maximum(m_old, jnp.max(logits, axis=-1, keepdims=True))
    l_s[...] = l_s[...] * jnp.exp(m_old - m_new) + jnp.sum(jnp.exp(logits - m_new),
                                                           axis=-1, keepdims=True)
    m_s[...] = m_new

    @pl.when(j == pl.num_programs(0) - 1)
    def _():
        lse_ref[...] = m_s[...] + jnp.log(l_s[...])


def decoder_att_rnn1(input_ids, hidden, enc_output, params, elem_dt=None):
    if elem_dt is None:
        elem_dt = _default_elementwise_dtype()

    B, H = hidden.shape
    S = enc_output.shape[1]
    U = params['att_w1'].shape[1]
    V = params['fc_w'].shape[1]

    B_pad = _round_up(B, 8)                       # sublane multiple
    TILE_V = min(2048, _round_up(V, 128))         # lane-dense vocab tile (single tile if small)
    V_pad = _round_up(V, TILE_V)
    NV = V_pad // TILE_V

    def pad_batch(x):
        return jnp.pad(x, ((0, B_pad - B),) + ((0, 0),) * (x.ndim - 1))

    hidden_p = pad_batch(hidden.astype(jnp.float32))
    enc_p = pad_batch(enc_output).astype(jnp.bfloat16)
    ids_p = jnp.pad(input_ids, ((0, B_pad - B), (0, 0)))

    # Embedding lookup: glue gather kept in XLA (bf16 table).
    x_emb = params['embedding'][ids_p[:, 0]]                                  # (B_pad, E) bf16

    # Decode-step-invariant attention key projection, hoisted out of the kernel and passed bf16.
    # (Inside a real decode loop this is computed once per sequence, not once per token.)
    w2vb = (jnp.einsum('bsh,hu->bsu', enc_p, params['att_w2'],
                       preferred_element_type=jnp.float32)
            + params['att_b'][None, :, :]).astype(jnp.bfloat16)               # (B_pad, S, U)

    # Pad fc over the vocab axis.  Pad bias = -1e30 so padded logits vanish in the softmax.
    fc_w = jnp.pad(params['fc_w'], ((0, 0), (0, V_pad - V)))
    fc_b = jnp.pad(params['fc_b'], ((0, 0), (0, V_pad - V)), constant_values=-1e30)

    args = (hidden_p, enc_p, x_emb, w2vb,
            params['att_w1'], params['att_v'],
            params['g1_wc'], params['g1_we'], params['g1_bi'], params['g1_bh'],
            params['g_w'], params['g_bi'], params['g_bh'],
            fc_w, fc_b)

    def full_spec(a):
        nd = a.ndim
        return pl.BlockSpec(a.shape, lambda j, _nd=nd: (0,) * _nd)

    in_specs = ([full_spec(a) for a in args[:-2]]
                + [pl.BlockSpec((U, TILE_V), lambda j: (0, j)),      # fc_w vocab tiles
                   pl.BlockSpec((1, TILE_V), lambda j: (0, j))])     # fc_b vocab tiles

    out_shape = (jax.ShapeDtypeStruct((B_pad, V_pad), jnp.bfloat16),  # logits (bf16 writeback)
                 jax.ShapeDtypeStruct((B_pad, 1), jnp.float32),       # logsumexp
                 jax.ShapeDtypeStruct((B_pad, U), jnp.float32),       # gru_4 state
                 jax.ShapeDtypeStruct((B_pad, S), jnp.float32))       # attention weights
    out_specs = (pl.BlockSpec((B_pad, TILE_V), lambda j: (0, j)),
                 pl.BlockSpec((B_pad, 1), lambda j: (0, 0)),
                 pl.BlockSpec((B_pad, U), lambda j: (0, 0)),
                 pl.BlockSpec((B_pad, S), lambda j: (0, 0)))

    kernel = functools.partial(decoder_kernel, elem_dt)

    logits, lse, state_full, attn_full = pl.pallas_call(
        kernel,
        out_shape=out_shape,
        grid_spec=pltpu.PrefetchScalarGridSpec(
            num_scalar_prefetch=0,
            grid=(NV,),
            in_specs=in_specs,
            out_specs=out_specs,
            scratch_shapes=[pltpu.VMEM((B_pad, U), jnp.bfloat16),   # GRU output (fc input), bf16
                            pltpu.VMEM((B_pad, 1), jnp.float32),    # running max
                            pltpu.VMEM((B_pad, 1), jnp.float32)]),  # running sum-exp
        compiler_params=pltpu.CompilerParams(
            # vocab axis carries the streaming lse + resident scratch -> must be "arbitrary".
            dimension_semantics=("arbitrary",),
            vmem_limit_bytes=48 * 1024 * 1024),
    )(*args)

    # Final normalization: one cheap elementwise op; the expensive fc stays tiled in-kernel.
    logp = (logits.astype(jnp.float32) - lse)[:B, :V]
    state = state_full[:B][None, :, :]      # (1, B, U)  to match PyTorch GRU state
    attn = attn_full[:B][:, :, None]        # (B, S, 1)
    return logp, state, attn


def init_params(key, vocab, E, U, H):
    keys = iter(jax.random.split(key, 16))

    def rnd(shape, scale=0.1, dtype=jnp.float32):
        return (scale * jax.random.normal(next(keys), shape)).astype(dtype)

    bf16 = jnp.bfloat16
    p = {}
    p['embedding'] = rnd((vocab, E), 1.0, bf16)
    # Bahdanau attention:  score = V . tanh(W1 q + W2 v + b)   (scorer bias cancels in softmax)
    p['att_w1'] = rnd((H, U), 0.1, bf16)
    p['att_w2'] = rnd((H, U), 0.1, bf16)
    p['att_b'] = rnd((1, U))
    p['att_v'] = rnd((1, U))
    # GRU 1: input = [context(H) ; embedded(E)]; gates packed [r|z|n] along the last axis.
    p['g1_wc'] = rnd((H, 3 * U), 0.1, bf16)
    p['g1_we'] = rnd((E, 3 * U), 0.1, bf16)
    p['g1_bi'] = rnd((1, 3 * U))
    p['g1_bh'] = rnd((1, 3 * U))
    # GRUs 2..4 stacked along the leading axis, gates packed the same way.
    p['g_w'] = rnd((3, U, 3 * U), 0.1, bf16)
    p['g_bi'] = rnd((3, 1, 3 * U))
    p['g_bh'] = rnd((3, 1, 3 * U))
    # fc (dec_units == hidden_size required by the reference module)
    p['fc_w'] = rnd((U, vocab), 0.1, bf16)
    p['fc_b'] = rnd((1, vocab))
    return p


def reference(input_ids, hidden, enc, p, elem_dt):
    """Pure-JAX reference of the same forward pass, matching the kernel's precision choices
    (bf16 weights / w2vb / logits storage, elem_dt attention elementwise, f32 accumulation)."""
    f32 = jnp.float32
    bf16 = jnp.bfloat16
    U = p['att_w1'].shape[1]
    x_emb = p['embedding'][input_ids[:, 0]].astype(f32)
    encq = enc.astype(bf16).astype(f32)
    hq = hidden.astype(bf16).astype(f32)

    w1q = hq @ p['att_w1'].astype(f32)
    w2vb = (jnp.einsum('bsh,hu->bsu', encq, p['att_w2'].astype(f32))
            + p['att_b'][None]).astype(bf16)
    t = jnp.tanh(w1q.astype(elem_dt)[:, None, :] + w2vb.astype(elem_dt))
    score = jnp.sum((t * p['att_v'].astype(elem_dt)[None]).astype(f32), axis=-1)
    attn = jax.nn.softmax(score, axis=-1)
    context = jnp.einsum('bs,bsh->bh', attn.astype(bf16).astype(f32), encq)

    def mm(x, w):
        return jnp.dot(x.astype(bf16).astype(f32), w.astype(f32))

    def gru(g, bh):
        r = jax.nn.sigmoid(g[:, :U] + bh[:, :U])
        z = jax.nn.sigmoid(g[:, U:2 * U] + bh[:, U:2 * U])
        n = jnp.tanh(g[:, 2 * U:] + r * bh[:, 2 * U:])
        return (1.0 - z) * n

    g1 = mm(context, p['g1_wc']) + mm(x_emb, p['g1_we']) + p['g1_bi']
    out = gru(g1, p['g1_bh'])
    h_last = out
    for i in range(3):
        gi = mm(out, p['g_w'][i]) + p['g_bi'][i]
        h_i = gru(gi, p['g_bh'][i])
        h_last = h_i
        out = out + h_i
    logits = mm(out, p['fc_w']) + p['fc_b']
    lse = jax.scipy.special.logsumexp(logits, axis=-1, keepdims=True)
    logp = logits.astype(bf16).astype(f32) - lse     # kernel stores logits in bf16
    return logp, h_last[None], attn[:, :, None]


if __name__ == "__main__":
    vocab_size, embedding_dim, dec_units, hidden_size = 32, 16, 32, 32
    B, S = 2, 8

    key = jax.random.PRNGKey(0)
    kp, ki, kh, ke = jax.random.split(key, 4)
    params = init_params(kp, vocab_size, embedding_dim, dec_units, hidden_size)

    input_ids = jax.random.randint(ki, (B, 1), 0, vocab_size, dtype=jnp.int32)
    hidden = (0.1 * jax.random.normal(kh, (B, hidden_size))).astype(jnp.float32)
    enc_output = (0.1 * jax.random.normal(ke, (B, S, hidden_size))).astype(jnp.float32)

    elem_dt = _default_elementwise_dtype()
    logp, state, attn = decoder_att_rnn1(input_ids, hidden, enc_output, params, elem_dt=elem_dt)
    jax.block_until_ready((logp, state, attn))

    r_logp, r_state, r_attn = reference(input_ids, hidden, enc_output, params, elem_dt)
    np.testing.assert_allclose(np.asarray(logp), np.asarray(r_logp), rtol=2e-3, atol=2e-3)
    np.testing.assert_allclose(np.asarray(state), np.asarray(r_state), rtol=2e-3, atol=2e-3)
    np.testing.assert_allclose(np.asarray(attn), np.asarray(r_attn), rtol=2e-3, atol=2e-3)

    print("KERNEL_OK")
</pallas_src>

<mosaic_0001>
module attributes {stable_mosaic.version = 11 : i64} {
  func.func @decoder_kernel(%arg0: i32, %arg1: memref<8x32xf32, #tpu.memory_space<vmem>>, %arg2: memref<8x8x32xbf16, #tpu.memory_space<vmem>>, %arg3: memref<8x16xbf16, #tpu.memory_space<vmem>>, %arg4: memref<8x8x32xbf16, #tpu.memory_space<vmem>>, %arg5: memref<32x32xbf16, #tpu.memory_space<vmem>>, %arg6: memref<1x32xf32, #tpu.memory_space<vmem>>, %arg7: memref<32x96xbf16, #tpu.memory_space<vmem>>, %arg8: memref<16x96xbf16, #tpu.memory_space<vmem>>, %arg9: memref<1x96xf32, #tpu.memory_space<vmem>>, %arg10: memref<1x96xf32, #tpu.memory_space<vmem>>, %arg11: memref<3x32x96xbf16, #tpu.memory_space<vmem>>, %arg12: memref<3x1x96xf32, #tpu.memory_space<vmem>>, %arg13: memref<3x1x96xf32, #tpu.memory_space<vmem>>, %arg14: memref<32x128xbf16, #tpu.memory_space<vmem>>, %arg15: memref<1x128xf32, #tpu.memory_space<vmem>>, %arg16: memref<8x128xbf16, #tpu.memory_space<vmem>>, %arg17: memref<8x1xf32, #tpu.memory_space<vmem>>, %arg18: memref<8x32xf32, #tpu.memory_space<vmem>>, %arg19: memref<8x8xf32, #tpu.memory_space<vmem>>, %arg20: memref<8x32xbf16, #tpu.memory_space<vmem>>, %arg21: memref<8x1xf32, #tpu.memory_space<vmem>>, %arg22: memref<8x1xf32, #tpu.memory_space<vmem>>) attributes {dimension_semantics = [#tpu.dimension_semantics<arbitrary>], iteration_bounds = array<i64: 1>, scalar_prefetch = 0 : i64, scratch_operands = 3 : i64, tpu.core_type = #tpu.core_type<tc>, window_params = [{pipeline_mode = #tpu.pipeline_mode<synchronous>, transform_indices = @transform_0, window_bounds = array<i64: 8, 32>}, {pipeline_mode = #tpu.pipeline_mode<synchronous>, transform_indices = @transform_1, window_bounds = array<i64: 8, 8, 32>}, {pipeline_mode = #tpu.pipeline_mode<synchronous>, transform_indices = @transform_2, window_bounds = array<i64: 8, 16>}, {pipeline_mode = #tpu.pipeline_mode<synchronous>, transform_indices = @transform_3, window_bounds = array<i64: 8, 8, 32>}, {pipeline_mode = #tpu.pipeline_mode<synchronous>, transform_indices = @transform_4, window_bounds = array<i64: 32, 32>}, {pipeline_mode = #tpu.pipeline_mode<synchronous>, transform_indices = @transform_5, window_bounds = array<i64: 1, 32>}, {pipeline_mode = #tpu.pipeline_mode<synchronous>, transform_indices = @transform_6, window_bounds = array<i64: 32, 96>}, {pipeline_mode = #tpu.pipeline_mode<synchronous>, transform_indices = @transform_7, window_bounds = array<i64: 16, 96>}, {pipeline_mode = #tpu.pipeline_mode<synchronous>, transform_indices = @transform_8, window_bounds = array<i64: 1, 96>}, {pipeline_mode = #tpu.pipeline_mode<synchronous>, transform_indices = @transform_9, window_bounds = array<i64: 1, 96>}, {pipeline_mode = #tpu.pipeline_mode<synchronous>, transform_indices = @transform_10, window_bounds = array<i64: 3, 32, 96>}, {pipeline_mode = #tpu.pipeline_mode<synchronous>, transform_indices = @transform_11, window_bounds = array<i64: 3, 1, 96>}, {pipeline_mode = #tpu.pipeline_mode<synchronous>, transform_indices = @transform_12, window_bounds = array<i64: 3, 1, 96>}, {transform_indices = @transform_13, window_bounds = array<i64: 32, 128>}, {transform_indices = @transform_14, window_bounds = array<i64: 1, 128>}, {transform_indices = @transform_15, window_bounds = array<i64: 8, 128>}, {pipeline_mode = #tpu.pipeline_mode<synchronous>, transform_indices = @transform_16, window_bounds = array<i64: 8, 1>}, {pipeline_mode = #tpu.pipeline_mode<synchronous>, transform_indices = @transform_17, window_bounds = array<i64: 8, 32>}, {pipeline_mode = #tpu.pipeline_mode<synchronous>, transform_indices = @transform_18, window_bounds = array<i64: 8, 8>}]} {
    %c0_i32 = arith.constant 0 : i32
    %0 = arith.cmpi eq, %arg0, %c0_i32 : i32
    %1 = arith.extui %0 : i1 to i32
    %c0_i32_0 = arith.constant 0 : i32
    %2 = arith.cmpi ne, %1, %c0_i32_0 : i32
    scf.if %2 {
      %c0_20 = arith.constant 0 : index
      %c0_21 = arith.constant 0 : index
      %30 = vector.load %arg1[%c0_20, %c0_21] : memref<8x32xf32, #tpu.memory_space<vmem>>, vector<8x32xf32>
      %31 = arith.truncf %30 : vector<8x32xf32> to vector<8x32xbf16>
      %c0_22 = arith.constant 0 : index
      %c0_23 = arith.constant 0 : index
      %32 = vector.load %arg5[%c0_22, %c0_23] : memref<32x32xbf16, #tpu.memory_space<vmem>>, vector<32x32xbf16>
      %cst_24 = arith.constant dense<0.000000e+00> : vector<8x32xf32>
      %33 = tpu.matmul %31, %32, %cst_24 {dimension_numbers = #tpu.dot_dimension_numbers<[1], [0], [0], [1], [0, 0, 1, 1], [], []>} : vector<8x32xbf16>, vector<32x32xbf16>, vector<8x32xf32> -> vector<8x32xf32>
      %34 = arith.truncf %33 : vector<8x32xf32> to vector<8x32xbf16>
      %35 = vector.shape_cast %34 : vector<8x32xbf16> to vector<8x1x32xbf16>
      %c0_25 = arith.constant 0 : index
      %c0_26 = arith.constant 0 : index
      %c0_27 = arith.constant 0 : index
      %36 = vector.load %arg4[%c0_25, %c0_26, %c0_27] : memref<8x8x32xbf16, #tpu.memory_space<vmem>>, vector<8x8x32xbf16>
      %37 = vector.broadcast %35 : vector<8x1x32xbf16> to vector<8x8x32xbf16>
      %38 = arith.addf %37, %36 : vector<8x8x32xbf16>
      %39 = math.tanh %38 : vector<8x8x32xbf16>
      %c0_28 = arith.constant 0 : index
      %c0_29 = arith.constant 0 : index
      %40 = vector.load %arg6[%c0_28, %c0_29] : memref<1x32xf32, #tpu.memory_space<vmem>>, vector<1x32xf32>
      %41 = arith.truncf %40 : vector<1x32xf32> to vector<1x32xbf16>
      %42 = vector.shape_cast %41 : vector<1x32xbf16> to vector<1x1x32xbf16>
      %43 = vector.broadcast %42 : vector<1x1x32xbf16> to vector<8x8x32xbf16>
      %44 = arith.mulf %39, %43 : vector<8x8x32xbf16>
      %45 = arith.extf %44 : vector<8x8x32xbf16> to vector<8x8x32xf32>
      %cst_30 = arith.constant dense<0.000000e+00> : vector<8x8xf32>
      %46 = vector.multi_reduction <add>, %45, %cst_30 [2] : vector<8x8x32xf32> to vector<8x8xf32>
      %cst_31 = arith.constant dense<0xFF800000> : vector<8xf32>
      %47 = vector.multi_reduction <maximumf>, %46, %cst_31 [1] : vector<8x8xf32> to vector<8xf32>
      %48 = vector.shape_cast %47 : vector<8xf32> to vector<8x1xf32>
      %49 = vector.broadcast %48 : vector<8x1xf32> to vector<8x8xf32>
      %50 = arith.subf %46, %49 : vector<8x8xf32>
      %51 = math.exp %50 : vector<8x8xf32>
      %cst_32 = arith.constant dense<0.000000e+00> : vector<8xf32>
      %52 = vector.multi_reduction <add>, %51, %cst_32 [1] : vector<8x8xf32> to vector<8xf32>
      %53 = vector.shape_cast %52 : vector<8xf32> to vector<8x1xf32>
      %54 = vector.broadcast %53 : vector<8x1xf32> to vector<8x8xf32>
      %55 = arith.divf %51, %54 : vector<8x8xf32>
      %c0_33 = arith.constant 0 : index
      %c0_34 = arith.constant 0 : index
      %56 = vector.load %arg19[%c0_33, %c0_34] : memref<8x8xf32, #tpu.memory_space<vmem>>, vector<8x8xf32>
      tpu.vector_store %arg19[%c0_33, %c0_34], %55 {strides = array<i32>} : memref<8x8xf32, #tpu.memory_space<vmem>>, vector<8x8xf32>,
      %57 = arith.truncf %55 : vector<8x8xf32> to vector<8x8xbf16>
      %58 = vector.shape_cast %57 : vector<8x8xbf16> to vector<8x1x8xbf16>
      %c0_35 = arith.constant 0 : index
      %c0_36 = arith.constant 0 : index
      %c0_37 = arith.constant 0 : index
      %59 = vector.load %arg2[%c0_35, %c0_36, %c0_37] : memref<8x8x32xbf16, #tpu.memory_space<vmem>>, vector<8x8x32xbf16>
      "tpu.trace_start"() <{level = 10 : i32, message = "bqs,bsh->bqh"}> : () -> ()
      %cst_38 = arith.constant dense<0.000000e+00> : vector<8x1x32xf32>
      %60 = tpu.matmul %58, %59, %cst_38 {dimension_numbers = #tpu.dot_dimension_numbers<[2], [1], [1], [2], [0, 0, 0, 1, 1, 2], [0], [0]>} : vector<8x1x8xbf16>, vector<8x8x32xbf16>, vector<8x1x32xf32> -> vector<8x1x32xf32>
      "tpu.trace_stop"() : () -> ()
      %61 = vector.shape_cast %60 : vector<8x1x32xf32> to vector<8x32xf32>
      %62 = arith.truncf %61 : vector<8x32xf32> to vector<8x32xbf16>
      %c0_39 = arith.constant 0 : index
      %c0_40 = arith.constant 0 : index
      %63 = vector.load %arg7[%c0_39, %c0_40] : memref<32x96xbf16, #tpu.memory_space<vmem>>, vector<32x96xbf16>
      %cst_41 = arith.constant dense<0.000000e+00> : vector<8x96xf32>
      %64 = tpu.matmul %62, %63, %cst_41 {dimension_numbers = #tpu.dot_dimension_numbers<[1], [0], [0], [1], [0, 0, 1, 1], [], []>} : vector<8x32xbf16>, vector<32x96xbf16>, vector<8x96xf32> -> vector<8x96xf32>
      %c0_42 = arith.constant 0 : index
      %c0_43 = arith.constant 0 : index
      %65 = vector.load %arg3[%c0_42, %c0_43] : memref<8x16xbf16, #tpu.memory_space<vmem>>, vector<8x16xbf16>
      %c0_44 = arith.constant 0 : index
      %c0_45 = arith.constant 0 : index
      %66 = vector.load %arg8[%c0_44, %c0_45] : memref<16x96xbf16, #tpu.memory_space<vmem>>, vector<16x96xbf16>
      %cst_46 = arith.constant dense<0.000000e+00> : vector<8x96xf32>
      %67 = tpu.matmul %65, %66, %cst_46 {dimension_numbers = #tpu.dot_dimension_numbers<[1], [0], [0], [1], [0, 0, 1, 1], [], []>} : vector<8x16xbf16>, vector<16x96xbf16>, vector<8x96xf32> -> vector<8x96xf32>
      %68 = arith.addf %64, %67 : vector<8x96xf32>
      %c0_47 = arith.constant 0 : index
      %c0_48 = arith.constant 0 : index
      %69 = vector.load %arg9[%c0_47, %c0_48] : memref<1x96xf32, #tpu.memory_space<vmem>>, vector<1x96xf32>
      %70 = vector.broadcast %69 : vector<1x96xf32> to vector<8x96xf32>
      %71 = arith.addf %68, %70 : vector<8x96xf32>
      %c0_49 = arith.constant 0 : index
      %c0_50 = arith.constant 0 : index
      %72 = vector.load %arg10[%c0_49, %c0_50] : memref<1x96xf32, #tpu.memory_space<vmem>>, vector<1x96xf32>
      %73 = vector.extract_strided_slice %71 {offsets = [0, 0], sizes = [8, 32], strides = [1, 1]} : vector<8x96xf32> to vector<8x32xf32>
      %74 = vector.extract_strided_slice %72 {offsets = [0, 0], sizes = [1, 32], strides = [1, 1]} : vector<1x96xf32> to vector<1x32xf32>
      %75 = vector.broadcast %74 : vector<1x32xf32> to vector<8x32xf32>
      %76 = arith.addf %73, %75 : vector<8x32xf32>
      %77 = arith.negf %76 : vector<8x32xf32>
      %78 = math.exp %77 : vector<8x32xf32>
      %cst_51 = arith.constant 1.000000e+00 : f32
      %79 = vector.broadcast %cst_51 : f32 to vector<8x32xf32>
      %80 = arith.addf %79, %78 : vector<8x32xf32>
      %81 = arith.divf %79, %80 : vector<8x32xf32>
      %82 = vector.extract_strided_slice %71 {offsets = [0, 32], sizes = [8, 32], strides = [1, 1]} : vector<8x96xf32> to vector<8x32xf32>
      %83 = vector.extract_strided_slice %72 {offsets = [0, 32], sizes = [1, 32], strides = [1, 1]} : vector<1x96xf32> to vector<1x32xf32>
      %84 = vector.broadcast %83 : vector<1x32xf32> to vector<8x32xf32>
      %85 = arith.addf %82, %84 : vector<8x32xf32>
      %86 = arith.negf %85 : vector<8x32xf32>
      %87 = math.exp %86 : vector<8x32xf32>
      %cst_52 = arith.constant 1.000000e+00 : f32
      %88 = vector.broadcast %cst_52 : f32 to vector<8x32xf32>
      %89 = arith.addf %88, %87 : vector<8x32xf32>
      %90 = arith.divf %88, %89 : vector<8x32xf32>
      %91 = vector.extract_strided_slice %71 {offsets = [0, 64], sizes = [8, 32], strides = [1, 1]} : vector<8x96xf32> to vector<8x32xf32>
      %92 = vector.extract_strided_slice %72 {offsets = [0, 64], sizes = [1, 32], strides = [1, 1]} : vector<1x96xf32> to vector<1x32xf32>
      %93 = vector.broadcast %92 : vector<1x32xf32> to vector<8x32xf32>
      %94 = arith.mulf %81, %93 : vector<8x32xf32>
      %95 = arith.addf %91, %94 : vector<8x32xf32>
      %96 = math.tanh %95 : vector<8x32xf32>
      %cst_53 = arith.constant 1.000000e+00 : f32
      %97 = vector.broadcast %cst_53 : f32 to vector<8x32xf32>
      %98 = arith.subf %97, %90 : vector<8x32xf32>
      %99 = arith.mulf %98, %96 : vector<8x32xf32>
      %100 = arith.truncf %99 : vector<8x32xf32> to vector<8x32xbf16>
      %c0_54 = arith.constant 0 : index
      %c0_55 = arith.constant 0 : index
      %c0_56 = arith.constant 0 : index
      %101 = vector.load %arg11[%c0_54, %c0_55, %c0_56] : memref<3x32x96xbf16, #tpu.memory_space<vmem>>, vector<1x32x96xbf16>
      %102 = vector.shape_cast %101 : vector<1x32x96xbf16> to vector<32x96xbf16>
      %cst_57 = arith.constant dense<0.000000e+00> : vector<8x96xf32>
      %103 = tpu.matmul %100, %102, %cst_57 {dimension_numbers = #tpu.dot_dimension_numbers<[1], [0], [0], [1], [0, 0, 1, 1], [], []>} : vector<8x32xbf16>, vector<32x96xbf16>, vector<8x96xf32> -> vector<8x96xf32>
      %c0_58 = arith.constant 0 : index
      %c0_59 = arith.constant 0 : index
      %c0_60 = arith.constant 0 : index
      %104 = vector.load %arg12[%c0_58, %c0_59, %c0_60] : memref<3x1x96xf32, #tpu.memory_space<vmem>>, vector<1x1x96xf32>
      %105 = vector.shape_cast %104 : vector<1x1x96xf32> to vector<1x96xf32>
      %106 = vector.broadcast %105 : vector<1x96xf32> to vector<8x96xf32>
      %107 = arith.addf %103, %106 : vector<8x96xf32>
      %c0_61 = arith.constant 0 : index
      %c0_62 = arith.constant 0 : index
      %c0_63 = arith.constant 0 : index
      %108 = vector.load %arg13[%c0_61, %c0_62, %c0_63] : memref<3x1x96xf32, #tpu.memory_space<vmem>>, vector<1x1x96xf32>
      %109 = vector.shape_cast %108 : vector<1x1x96xf32> to vector<1x96xf32>
      %110 = vector.extract_strided_slice %107 {offsets = [0, 0], sizes = [8, 32], strides = [1, 1]} : vector<8x96xf32> to vector<8x32xf32>
      %111 = vector.extract_strided_slice %109 {offsets = [0, 0], sizes = [1, 32], strides = [1, 1]} : vector<1x96xf32> to vector<1x32xf32>
      %112 = vector.broadcast %111 : vector<1x32xf32> to vector<8x32xf32>
      %113 = arith.addf %110, %112 : vector<8x32xf32>
      %114 = arith.negf %113 : vector<8x32xf32>
      %115 = math.exp %114 : vector<8x32xf32>
      %cst_64 = arith.constant 1.000000e+00 : f32
      %116 = vector.broadcast %cst_64 : f32 to vector<8x32xf32>
      %117 = arith.addf %116, %115 : vector<8x32xf32>
      %118 = arith.divf %116, %117 : vector<8x32xf32>
      %119 = vector.extract_strided_slice %107 {offsets = [0, 32], sizes = [8, 32], strides = [1, 1]} : vector<8x96xf32> to vector<8x32xf32>
      %120 = vector.extract_strided_slice %109 {offsets = [0, 32], sizes = [1, 32], strides = [1, 1]} : vector<1x96xf32> to vector<1x32xf32>
      %121 = vector.broadcast %120 : vector<1x32xf32> to vector<8x32xf32>
      %122 = arith.addf %119, %121 : vector<8x32xf32>
      %123 = arith.negf %122 : vector<8x32xf32>
      %124 = math.exp %123 : vector<8x32xf32>
      %cst_65 = arith.constant 1.000000e+00 : f32
      %125 = vector.broadcast %cst_65 : f32 to vector<8x32xf32>
      %126 = arith.addf %125, %124 : vector<8x32xf32>
      %127 = arith.divf %125, %126 : vector<8x32xf32>
      %128 = vector.extract_strided_slice %107 {offsets = [0, 64], sizes = [8, 32], strides = [1, 1]} : vector<8x96xf32> to vector<8x32xf32>
      %129 = vector.extract_strided_slice %109 {offsets = [0, 64], sizes = [1, 32], strides = [1, 1]} : vector<1x96xf32> to vector<1x32xf32>
      %130 = vector.broadcast %129 : vector<1x32xf32> to vector<8x32xf32>
      %131 = arith.mulf %118, %130 : vector<8x32xf32>
      %132 = arith.addf %128, %131 : vector<8x32xf32>
      %133 = math.tanh %132 : vector<8x32xf32>
      %cst_66 = arith.constant 1.000000e+00 : f32
      %134 = vector.broadcast %cst_66 : f32 to vector<8x32xf32>
      %135 = arith.subf %134, %127 : vector<8x32xf32>
      %136 = arith.mulf %135, %133 : vector<8x32xf32>
      %137 = arith.addf %99, %136 : vector<8x32xf32>
      %138 = arith.truncf %137 : vector<8x32xf32> to vector<8x32xbf16>
      %c1 = arith.constant 1 : index
      %c0_67 = arith.constant 0 : index
      %c0_68 = arith.constant 0 : index
      %139 = vector.load %arg11[%c1, %c0_67, %c0_68] : memref<3x32x96xbf16, #tpu.memory_space<vmem>>, vector<1x32x96xbf16>
      %140 = vector.shape_cast %139 : vector<1x32x96xbf16> to vector<32x96xbf16>
      %cst_69 = arith.constant dense<0.000000e+00> : vector<8x96xf32>
      %141 = tpu.matmul %138, %140, %cst_69 {dimension_numbers = #tpu.dot_dimension_numbers<[1], [0], [0], [1], [0, 0, 1, 1], [], []>} : vector<8x32xbf16>, vector<32x96xbf16>, vector<8x96xf32> -> vector<8x96xf32>
      %c1_70 = arith.constant 1 : index
      %c0_71 = arith.constant 0 : index
      %c0_72 = arith.constant 0 : index
      %142 = vector.load %arg12[%c1_70, %c0_71, %c0_72] : memref<3x1x96xf32, #tpu.memory_space<vmem>>, vector<1x1x96xf32>
      %143 = vector.shape_cast %142 : vector<1x1x96xf32> to vector<1x96xf32>
      %144 = vector.broadcast %143 : vector<1x96xf32> to vector<8x96xf32>
      %145 = arith.addf %141, %144 : vector<8x96xf32>
      %c1_73 = arith.constant 1 : index
      %c0_74 = arith.constant 0 : index
      %c0_75 = arith.constant 0 : index
      %146 = vector.load %arg13[%c1_73, %c0_74, %c0_75] : memref<3x1x96xf32, #tpu.memory_space<vmem>>, vector<1x1x96xf32>
      %147 = vector.shape_cast %146 : vector<1x1x96xf32> to vector<1x96xf32>
      %148 = vector.extract_strided_slice %145 {offsets = [0, 0], sizes = [8, 32], strides = [1, 1]} : vector<8x96xf32> to vector<8x32xf32>
      %149 = vector.extract_strided_slice %147 {offsets = [0, 0], sizes = [1, 32], strides = [1, 1]} : vector<1x96xf32> to vector<1x32xf32>
      %150 = vector.broadcast %149 : vector<1x32xf32> to vector<8x32xf32>
      %151 = arith.addf %148, %150 : vector<8x32xf32>
      %152 = arith.negf %151 : vector<8x32xf32>
      %153 = math.exp %152 : vector<8x32xf32>
      %cst_76 = arith.constant 1.000000e+00 : f32
      %154 = vector.broadcast %cst_76 : f32 to vector<8x32xf32>
      %155 = arith.addf %154, %153 : vector<8x32xf32>
      %156 = arith.divf %154, %155 : vector<8x32xf32>
      %157 = vector.extract_strided_slice %145 {offsets = [0, 32], sizes = [8, 32], strides = [1, 1]} : vector<8x96xf32> to vector<8x32xf32>
      %158 = vector.extract_strided_slice %147 {offsets = [0, 32], sizes = [1, 32], strides = [1, 1]} : vector<1x96xf32> to vector<1x32xf32>
      %159 = vector.broadcast %158 : vector<1x32xf32> to vector<8x32xf32>
      %160 = arith.addf %157, %159 : vector<8x32xf32>
      %161 = arith.negf %160 : vector<8x32xf32>
      %162 = math.exp %161 : vector<8x32xf32>
      %cst_77 = arith.constant 1.000000e+00 : f32
      %163 = vector.broadcast %cst_77 : f32 to vector<8x32xf32>
      %164 = arith.addf %163, %162 : vector<8x32xf32>
      %165 = arith.divf %163, %164 : vector<8x32xf32>
      %166 = vector.extract_strided_slice %145 {offsets = [0, 64], sizes = [8, 32], strides = [1, 1]} : vector<8x96xf32> to vector<8x32xf32>
      %167 = vector.extract_strided_slice %147 {offsets = [0, 64], sizes = [1, 32], strides = [1, 1]} : vector<1x96xf32> to vector<1x32xf32>
      %168 = vector.broadcast %167 : vector<1x32xf32> to vector<8x32xf32>
      %169 = arith.mulf %156, %168 : vector<8x32xf32>
      %170 = arith.addf %166, %169 : vector<8x32xf32>
      %171 = math.tanh %170 : vector<8x32xf32>
      %cst_78 = arith.constant 1.000000e+00 : f32
      %172 = vector.broadcast %cst_78 : f32 to vector<8x32xf32>
      %173 = arith.subf %172, %165 : vector<8x32xf32>
      %174 = arith.mulf %173, %171 : vector<8x32xf32>
      %175 = arith.addf %137, %174 : vector<8x32xf32>
      %176 = arith.truncf %175 : vector<8x32xf32> to vector<8x32xbf16>
      %c2 = arith.constant 2 : index
      %c0_79 = arith.constant 0 : index
      %c0_80 = arith.constant 0 : index
      %177 = vector.load %arg11[%c2, %c0_79, %c0_80] : memref<3x32x96xbf16, #tpu.memory_space<vmem>>, vector<1x32x96xbf16>
      %178 = vector.shape_cast %177 : vector<1x32x96xbf16> to vector<32x96xbf16>
      %cst_81 = arith.constant dense<0.000000e+00> : vector<8x96xf32>
      %179 = tpu.matmul %176, %178, %cst_81 {dimension_numbers = #tpu.dot_dimension_numbers<[1], [0], [0], [1], [0, 0, 1, 1], [], []>} : vector<8x32xbf16>, vector<32x96xbf16>, vector<8x96xf32> -> vector<8x96xf32>
      %c2_82 = arith.constant 2 : index
      %c0_83 = arith.constant 0 : index
      %c0_84 = arith.constant 0 : index
      %180 = vector.load %arg12[%c2_82, %c0_83, %c0_84] : memref<3x1x96xf32, #tpu.memory_space<vmem>>, vector<1x1x96xf32>
      %181 = vector.shape_cast %180 : vector<1x1x96xf32> to vector<1x96xf32>
      %182 = vector.broadcast %181 : vector<1x96xf32> to vector<8x96xf32>
      %183 = arith.addf %179, %182 : vector<8x96xf32>
      %c2_85 = arith.constant 2 : index
      %c0_86 = arith.constant 0 : index
      %c0_87 = arith.constant 0 : index
      %184 = vector.load %arg13[%c2_85, %c0_86, %c0_87] : memref<3x1x96xf32, #tpu.memory_space<vmem>>, vector<1x1x96xf32>
      %185 = vector.shape_cast %184 : vector<1x1x96xf32> to vector<1x96xf32>
      %186 = vector.extract_strided_slice %183 {offsets = [0, 0], sizes = [8, 32], strides = [1, 1]} : vector<8x96xf32> to vector<8x32xf32>
      %187 = vector.extract_strided_slice %185 {offsets = [0, 0], sizes = [1, 32], strides = [1, 1]} : vector<1x96xf32> to vector<1x32xf32>
      %188 = vector.broadcast %187 : vector<1x32xf32> to vector<8x32xf32>
      %189 = arith.addf %186, %188 : vector<8x32xf32>
      %190 = arith.negf %189 : vector<8x32xf32>
      %191 = math.exp %190 : vector<8x32xf32>
      %cst_88 = arith.constant 1.000000e+00 : f32
      %192 = vector.broadcast %cst_88 : f32 to vector<8x32xf32>
      %193 = arith.addf %192, %191 : vector<8x32xf32>
      %194 = arith.divf %192, %193 : vector<8x32xf32>
      %195 = vector.extract_strided_slice %183 {offsets = [0, 32], sizes = [8, 32], strides = [1, 1]} : vector<8x96xf32> to vector<8x32xf32>
      %196 = vector.extract_strided_slice %185 {offsets = [0, 32], sizes = [1, 32], strides = [1, 1]} : vector<1x96xf32> to vector<1x32xf32>
      %197 = vector.broadcast %196 : vector<1x32xf32> to vector<8x32xf32>
      %198 = arith.addf %195, %197 : vector<8x32xf32>
      %199 = arith.negf %198 : vector<8x32xf32>
      %200 = math.exp %199 : vector<8x32xf32>
      %cst_89 = arith.constant 1.000000e+00 : f32
      %201 = vector.broadcast %cst_89 : f32 to vector<8x32xf32>
      %202 = arith.addf %201, %200 : vector<8x32xf32>
      %203 = arith.divf %201, %202 : vector<8x32xf32>
      %204 = vector.extract_strided_slice %183 {offsets = [0, 64], sizes = [8, 32], strides = [1, 1]} : vector<8x96xf32> to vector<8x32xf32>
      %205 = vector.extract_strided_slice %185 {offsets = [0, 64], sizes = [1, 32], strides = [1, 1]} : vector<1x96xf32> to vector<1x32xf32>
      %206 = vector.broadcast %205 : vector<1x32xf32> to vector<8x32xf32>
      %207 = arith.mulf %194, %206 : vector<8x32xf32>
      %208 = arith.addf %204, %207 : vector<8x32xf32>
      %209 = math.tanh %208 : vector<8x32xf32>
      %cst_90 = arith.constant 1.000000e+00 : f32
      %210 = vector.broadcast %cst_90 : f32 to vector<8x32xf32>
      %211 = arith.subf %210, %203 : vector<8x32xf32>
      %212 = arith.mulf %211, %209 : vector<8x32xf32>
      %213 = arith.addf %175, %212 : vector<8x32xf32>
      %c0_91 = arith.constant 0 : index
      %c0_92 = arith.constant 0 : index
      %214 = vector.load %arg18[%c0_91, %c0_92] : memref<8x32xf32, #tpu.memory_space<vmem>>, vector<8x32xf32>
      tpu.vector_store %arg18[%c0_91, %c0_92], %212 {strides = array<i32>} : memref<8x32xf32, #tpu.memory_space<vmem>>, vector<8x32xf32>,
      %215 = arith.truncf %213 : vector<8x32xf32> to vector<8x32xbf16>
      %c0_93 = arith.constant 0 : index
      %c0_94 = arith.constant 0 : index
      %216 = vector.load %arg20[%c0_93, %c0_94] : memref<8x32xbf16, #tpu.memory_space<vmem>>, vector<8x32xbf16>
      tpu.vector_store %arg20[%c0_93, %c0_94], %215 {strides = array<i32>} : memref<8x32xbf16, #tpu.memory_space<vmem>>, vector<8x32xbf16>,
      %cst_95 = arith.constant -1.000000e+30 : f32
      %217 = vector.broadcast %cst_95 : f32 to vector<8x1xf32>
      %c0_96 = arith.constant 0 : index
      %c0_97 = arith.constant 0 : index
      %218 = vector.load %arg21[%c0_96, %c0_97] : memref<8x1xf32, #tpu.memory_space<vmem>>, vector<8x1xf32>
      tpu.vector_store %arg21[%c0_96, %c0_97], %217 {strides = array<i32>} : memref<8x1xf32, #tpu.memory_space<vmem>>, vector<8x1xf32>,
      %cst_98 = arith.constant 0.000000e+00 : f32
      %219 = vector.broadcast %cst_98 : f32 to vector<8x1xf32>
      %c0_99 = arith.constant 0 : index
      %c0_100 = arith.constant 0 : index
      %220 = vector.load %arg22[%c0_99, %c0_100] : memref<8x1xf32, #tpu.memory_space<vmem>>, vector<8x1xf32>
      tpu.vector_store %arg22[%c0_99, %c0_100], %219 {strides = array<i32>} : memref<8x1xf32, #tpu.memory_space<vmem>>, vector<8x1xf32>,
    } else {
    }
    %c0 = arith.constant 0 : index
    %c0_1 = arith.constant 0 : index
    %3 = vector.load %arg20[%c0, %c0_1] : memref<8x32xbf16, #tpu.memory_space<vmem>>, vector<8x32xbf16>
    %c0_2 = arith.constant 0 : index
    %c0_3 = arith.constant 0 : index
    %4 = vector.load %arg14[%c0_2, %c0_3] : memref<32x128xbf16, #tpu.memory_space<vmem>>, vector<32x128xbf16>
    %cst = arith.constant dense<0.000000e+00> : vector<8x128xf32>
    %5 = tpu.matmul %3, %4, %cst {dimension_numbers = #tpu.dot_dimension_numbers<[1], [0], [0], [1], [0, 0, 1, 1], [], []>} : vector<8x32xbf16>, vector<32x128xbf16>, vector<8x128xf32> -> vector<8x128xf32>
    %c0_4 = arith.constant 0 : index
    %c0_5 = arith.constant 0 : index
    %6 = vector.load %arg15[%c0_4, %c0_5] : memref<1x128xf32, #tpu.memory_space<vmem>>, vector<1x128xf32>
    %7 = vector.broadcast %6 : vector<1x128xf32> to vector<8x128xf32>
    %8 = arith.addf %5, %7 : vector<8x128xf32>
    %9 = arith.truncf %8 : vector<8x128xf32> to vector<8x128xbf16>
    %c0_6 = arith.constant 0 : index
    %c0_7 = arith.constant 0 : index
    %10 = vector.load %arg16[%c0_6, %c0_7] : memref<8x128xbf16, #tpu.memory_space<vmem>>, vector<8x128xbf16>
    tpu.vector_store %arg16[%c0_6, %c0_7], %9 {strides = array<i32>} : memref<8x128xbf16, #tpu.memory_space<vmem>>, vector<8x128xbf16>,
    %c0_8 = arith.constant 0 : index
    %c0_9 = arith.constant 0 : index
    %11 = vector.load %arg21[%c0_8, %c0_9] : memref<8x1xf32, #tpu.memory_space<vmem>>, vector<8x1xf32>
    %cst_10 = arith.constant dense<0xFF800000> : vector<8xf32>
    %12 = vector.multi_reduction <maximumf>, %8, %cst_10 [1] : vector<8x128xf32> to vector<8xf32>
    %13 = vector.shape_cast %12 : vector<8xf32> to vector<8x1xf32>
    %14 = arith.maximumf %11, %13 : vector<8x1xf32>
    %c0_11 = arith.constant 0 : index
    %c0_12 = arith.constant 0 : index
    %15 = vector.load %arg22[%c0_11, %c0_12] : memref<8x1xf32, #tpu.memory_space<vmem>>, vector<8x1xf32>
    %16 = arith.subf %11, %14 : vector<8x1xf32>
    %17 = math.exp %16 : vector<8x1xf32>
    %18 = arith.mulf %15, %17 : vector<8x1xf32>
    %19 = vector.broadcast %14 : vector<8x1xf32> to vector<8x128xf32>
    %20 = arith.subf %8, %19 : vector<8x128xf32>
    %21 = math.exp %20 : vector<8x128xf32>
    %cst_13 = arith.constant dense<0.000000e+00> : vector<8xf32>
    %22 = vector.multi_reduction <add>, %21, %cst_13 [1] : vector<8x128xf32> to vector<8xf32>
    %23 = vector.shape_cast %22 : vector<8xf32> to vector<8x1xf32>
    %24 = arith.addf %18, %23 : vector<8x1xf32>
    %c0_14 = arith.constant 0 : index
    %c0_15 = arith.constant 0 : index
    %25 = vector.load %arg22[%c0_14, %c0_15] : memref<8x1xf32, #tpu.memory_space<vmem>>, vector<8x1xf32>
    tpu.vector_store %arg22[%c0_14, %c0_15], %24 {strides = array<i32>} : memref<8x1xf32, #tpu.memory_space<vmem>>, vector<8x1xf32>,
    %c0_16 = arith.constant 0 : index
    %c0_17 = arith.constant 0 : index
    %26 = vector.load %arg21[%c0_16, %c0_17] : memref<8x1xf32, #tpu.memory_space<vmem>>, vector<8x1xf32>
    tpu.vector_store %arg21[%c0_16, %c0_17], %14 {strides = array<i32>} : memref<8x1xf32, #tpu.memory_space<vmem>>, vector<8x1xf32>,
    %c0_i32_18 = arith.constant 0 : i32
    %27 = arith.cmpi eq, %arg0, %c0_i32_18 : i32
    %28 = arith.extui %27 : i1 to i32
    %c0_i32_19 = arith.constant 0 : i32
    %29 = arith.cmpi ne, %28, %c0_i32_19 : i32
    scf.if %29 {
      %c0_20 = arith.constant 0 : index
      %c0_21 = arith.constant 0 : index
      %30 = vector.load %arg21[%c0_20, %c0_21] : memref<8x1xf32, #tpu.memory_space<vmem>>, vector<8x1xf32>
      %c0_22 = arith.constant 0 : index
      %c0_23 = arith.constant 0 : index
      %31 = vector.load %arg22[%c0_22, %c0_23] : memref<8x1xf32, #tpu.memory_space<vmem>>, vector<8x1xf32>
      %32 = math.log %31 : vector<8x1xf32>
      %33 = arith.addf %30, %32 : vector<8x1xf32>
      %c0_24 = arith.constant 0 : index
      %c0_25 = arith.constant 0 : index
      %34 = vector.load %arg17[%c0_24, %c0_25] : memref<8x1xf32, #tpu.memory_space<vmem>>, vector<8x1xf32>
      tpu.vector_store %arg17[%c0_24, %c0_25], %33 {strides = array<i32>} : memref<8x1xf32, #tpu.memory_space<vmem>>, vector<8x1xf32>,
    } else {
    }
    return
  }
  func.func @transform_0(%arg0: i32) -> (i32, i32) {
    %c0_i32 = arith.constant 0 : i32
    %c0_i32_0 = arith.constant 0 : i32
    %c0_i32_1 = arith.constant 0 : i32
    return %c0_i32, %c0_i32_0 : i32, i32
  }
  func.func @transform_1(%arg0: i32) -> (i32, i32, i32) {
    %c0_i32 = arith.constant 0 : i32
    %c0_i32_0 = arith.constant 0 : i32
    %c0_i32_1 = arith.constant 0 : i32
    %c0_i32_2 = arith.constant 0 : i32
    return %c0_i32, %c0_i32_0, %c0_i32_1 : i32, i32, i32
  }
  func.func @transform_2(%arg0: i32) -> (i32, i32) {
    %c0_i32 = arith.constant 0 : i32
    %c0_i32_0 = arith.constant 0 : i32
    %c0_i32_1 = arith.constant 0 : i32
    return %c0_i32, %c0_i32_0 : i32, i32
  }
  func.func @transform_3(%arg0: i32) -> (i32, i32, i32) {
    %c0_i32 = arith.constant 0 : i32
    %c0_i32_0 = arith.constant 0 : i32
    %c0_i32_1 = arith.constant 0 : i32
    %c0_i32_2 = arith.constant 0 : i32
    return %c0_i32, %c0_i32_0, %c0_i32_1 : i32, i32, i32
  }
  func.func @transform_4(%arg0: i32) -> (i32, i32) {
    %c0_i32 = arith.constant 0 : i32
    %c0_i32_0 = arith.constant 0 : i32
    %c0_i32_1 = arith.constant 0 : i32
    return %c0_i32, %c0_i32_0 : i32, i32
  }
  func.func @transform_5(%arg0: i32) -> (i32, i32) {
    %c0_i32 = arith.constant 0 : i32
    %c0_i32_0 = arith.constant 0 : i32
    %c0_i32_1 = arith.constant 0 : i32
    return %c0_i32, %c0_i32_0 : i32, i32
  }
  func.func @transform_6(%arg0: i32) -> (i32, i32) {
    %c0_i32 = arith.constant 0 : i32
    %c0_i32_0 = arith.constant 0 : i32
    %c0_i32_1 = arith.constant 0 : i32
    return %c0_i32, %c0_i32_0 : i32, i32
  }
  func.func @transform_7(%arg0: i32) -> (i32, i32) {
    %c0_i32 = arith.constant 0 : i32
    %c0_i32_0 = arith.constant 0 : i32
    %c0_i32_1 = arith.constant 0 : i32
    return %c0_i32, %c0_i32_0 : i32, i32
  }
  func.func @transform_8(%arg0: i32) -> (i32, i32) {
    %c0_i32 = arith.constant 0 : i32
    %c0_i32_0 = arith.constant 0 : i32
    %c0_i32_1 = arith.constant 0 : i32
    return %c0_i32, %c0_i32_0 : i32, i32
  }
  func.func @transform_9(%arg0: i32) -> (i32, i32) {
    %c0_i32 = arith.constant 0 : i32
    %c0_i32_0 = arith.constant 0 : i32
    %c0_i32_1 = arith.constant 0 : i32
    return %c0_i32, %c0_i32_0 : i32, i32
  }
  func.func @transform_10(%arg0: i32) -> (i32, i32, i32) {
    %c0_i32 = arith.constant 0 : i32
    %c0_i32_0 = arith.constant 0 : i32
    %c0_i32_1 = arith.constant 0 : i32
    %c0_i32_2 = arith.constant 0 : i32
    return %c0_i32, %c0_i32_0, %c0_i32_1 : i32, i32, i32
  }
  func.func @transform_11(%arg0: i32) -> (i32, i32, i32) {
    %c0_i32 = arith.constant 0 : i32
    %c0_i32_0 = arith.constant 0 : i32
    %c0_i32_1 = arith.constant 0 : i32
    %c0_i32_2 = arith.constant 0 : i32
    return %c0_i32, %c0_i32_0, %c0_i32_1 : i32, i32, i32
  }
  func.func @transform_12(%arg0: i32) -> (i32, i32, i32) {
    %c0_i32 = arith.constant 0 : i32
    %c0_i32_0 = arith.constant 0 : i32
    %c0_i32_1 = arith.constant 0 : i32
    %c0_i32_2 = arith.constant 0 : i32
    return %c0_i32, %c0_i32_0, %c0_i32_1 : i32, i32, i32
  }
  func.func @transform_13(%arg0: i32) -> (i32, i32) {
    %c0_i32 = arith.constant 0 : i32
    %c0_i32_0 = arith.constant 0 : i32
    return %c0_i32, %arg0 : i32, i32
  }
  func.func @transform_14(%arg0: i32) -> (i32, i32) {
    %c0_i32 = arith.constant 0 : i32
    %c0_i32_0 = arith.constant 0 : i32
    return %c0_i32, %arg0 : i32, i32
  }
  func.func @transform_15(%arg0: i32) -> (i32, i32) {
    %c0_i32 = arith.constant 0 : i32
    %c0_i32_0 = arith.constant 0 : i32
    return %c0_i32, %arg0 : i32, i32
  }
  func.func @transform_16(%arg0: i32) -> (i32, i32) {
    %c0_i32 = arith.constant 0 : i32
    %c0_i32_0 = arith.constant 0 : i32
    %c0_i32_1 = arith.constant 0 : i32
    return %c0_i32, %c0_i32_0 : i32, i32
  }
  func.func @transform_17(%arg0: i32) -> (i32, i32) {
    %c0_i32 = arith.constant 0 : i32
    %c0_i32_0 = arith.constant 0 : i32
    %c0_i32_1 = arith.constant 0 : i32
    return %c0_i32, %c0_i32_0 : i32, i32
  }
  func.func @transform_18(%arg0: i32) -> (i32, i32) {
    %c0_i32 = arith.constant 0 : i32
    %c0_i32_0 = arith.constant 0 : i32
    %c0_i32_1 = arith.constant 0 : i32
    return %c0_i32, %c0_i32_0 : i32, i32
  }
}

</mosaic_0001>

<bundles_post_ra>
// kernel: tpu_custom_call.1
= control target key start
LH: loop header
LB: loop body
LE: loop exit
PB: predicated region body
PF: predicated region fallthrough
CT: control target
= control target key end

     0   :  { %s3068_s0 = inlined_call_operand.hbm [shape: f32[8,32], index: 0, kind: input, shape index: {}]   ;;  %s3069_s1 = inlined_call_operand.hbm [shape: bf16[8,8,32], index: 1, kind: input, shape index: {}]   ;;  %s3070_s2 = inlined_call_operand.hbm [shape: bf16[8,16], index: 2, kind: input, shape index: {}]   ;;  %s3071_s3 = inlined_call_operand.hbm [shape: bf16[8,8,32], index: 3, kind: input, shape index: {}]   ;;  %s3072_s4 = inlined_call_operand.hbm [shape: bf16[32,32], index: 4, kind: input, shape index: {}]   ;;  %s3073_s5 = inlined_call_operand.vmem [shape: f32[1,32], index: 5, kind: input, shape index: {}]   ;;  %s3074_s6 = inlined_call_operand.vmem [shape: bf16[32,96], index: 6, kind: input, shape index: {}]   ;;  %s3075_s7 = inlined_call_operand.hbm [shape: bf16[16,96], index: 7, kind: input, shape index: {}]   ;;  %s3076_s8 = inlined_call_operand.vmem [shape: f32[1,96], index: 8, kind: input, shape index: {}]   ;;  %s3077_s9 = inlined_call_operand.hbm [shape: f32[1,96], index: 9, kind: input, shape index: {}]   ;;  %s3078_s10 = inlined_call_operand.hbm [shape: bf16[3,32,96], index: 10, kind: input, shape index: {}]   ;;  %s3079_s11 = inlined_call_operand.vmem [shape: f32[3,1,96], index: 11, kind: input, shape index: {}]   ;;  %s3080_s12 = inlined_call_operand.vmem [shape: f32[3,1,96], index: 12, kind: input, shape index: {}]   ;;  %s3081_s13 = inlined_call_operand.vmem [shape: bf16[32,128], index: 13, kind: input, shape index: {}]   ;;  %s3082_s14 = inlined_call_operand.vmem [shape: f32[1,128], index: 14, kind: input, shape index: {}]   ;;  %s3083_s15 = inlined_call_operand.hbm [shape: bf16[8,128], index: 15, kind: output, shape index: {0}]   ;;  %s3084_s16 = inlined_call_operand.vmem [shape: f32[8,1], index: 16, kind: output, shape index: {1}]   ;;  %s3085_s17 = inlined_call_operand.hbm [shape: f32[8,32], index: 17, kind: output, shape index: {2}]   ;;  %s3086_s18 = inlined_call_operand.hbm [shape: f32[8,8], index: 18, kind: output, shape index: {3}]  }
   0x1   :  { %3091 = sst [smem:[#allocation30_spill]] %s3068_s0 }
   0x2   :  { %3092 = sst [smem:[#allocation31_spill]] %s3069_s1 }
   0x3   :  { %3093 = sst [smem:[#allocation32_spill]] %s3070_s2 }
   0x4   :  { %3094 = sst [smem:[#allocation33_spill]] %s3084_s16 }
   0x5   :  { %3095 = sst [smem:[#allocation34_spill]] %s3086_s18 }
   0x6   :  { %24 = vsyncpa [#allocation6], 0 }
   0x7   :  { %25 = vsyncpa [#allocation9], 0 }
   0x8   :  { %26 = vsyncpa [#allocation12], 0 }
   0x9   :  { %27 = vsyncpa [#allocation15], 0 }
   0xa   :  { %28 = vsyncpa [#allocation18], 0 }
   0xb   :  { %29 = vsyncpa [#allocation7], 0 }
   0xc   :  { %30 = vsyncpa [#allocation21], 0  ;;  %s2449_s27 = smov [#allocation8]   ;;  %s3096_s0 = sld [smem:[#allocation31_spill]] }
   0xd   :  { %s46_s28 = sshll.u32 %s2449_s27, 4  ;;  %s47_s28 = int_to_ptr.vmem [resolvable:$true] %s46_s28 }
  0x12   :  { %s2193_s19 = scalar_lea.hbm %s3096_s0, 512 }
  0x13   :  { %p2194_p0 = scmp.ne.s32.totalorder %s3096_s0, %s2193_s19  ;;  %p2197_p1 = scmp.lt.u32.totalorder %s2193_s19, %s3096_s0 }
  0x15   :  { %p2199_p2 = pnand %p2197_p1, %p2194_p0 }
  0x17   :  { %2202 = shalt.err (!%p2199_p2)
}
  0x18   :  { %s2203_s2 = scalar_lea.vmem %s47_s28, 512  ;;  %p2208_p4 = scmp.lt.s32.totalorder %s47_s28, %s47_s28 }
  0x19   :  { %p2204_p3 = scmp.ne.s32.totalorder %s47_s28, %s2203_s2  ;;  %p2209_p5 = scmp.lt.s32.totalorder %s2203_s2, %s2203_s2 }
  0x1b   :  { %p2210_p6 = por %p2209_p5, %p2208_p4 }
  0x1d   :  { %p2211_p7 = pnand %p2210_p6, %p2204_p3 }
  0x1f   :  { %2214 = shalt.err (!%p2211_p7)
}
  0x20   :  { %s2450_s23 = smov 64   ;;  %s2451_s24 = smov 4  }
  0x21   :  { %52 = dma.hbm_to_vmem [thread:$0]  %s3096_s0, 512, %s47_s28, [#allocation9], %s2450_s23, %s2450_s23, %s2451_s24  }
  0x22   :  { %s2452_s27 = smov [#allocation11]   ;;  %s2453_s30 = smov [#allocation14]  }
  0x23   :  { %s68_s29 = sshll.u32 %s2452_s27, 4  ;;  %s96_s19 = sshll.u32 %s2453_s30, 4  ;;  %s69_s29 = int_to_ptr.vmem [resolvable:$true] %s68_s29  ;;  %s97_s19 = int_to_ptr.vmem [resolvable:$true] %s96_s19 }
  0x24   :  { %s2215_s21 = scalar_lea.hbm %s3071_s3, 512 }
  0x25   :  { %p2216_p8 = scmp.ne.s32.totalorder %s3071_s3, %s2215_s21  ;;  %p2219_p9 = scmp.lt.u32.totalorder %s2215_s21, %s3071_s3 }
  0x27   :  { %p2221_p10 = pnand %p2219_p9, %p2216_p8 }
  0x29   :  { %2224 = shalt.err (!%p2221_p10)
}
  0x2a   :  { %s2225_s28 = scalar_lea.vmem %s69_s29, 512  ;;  %p2230_p12 = scmp.lt.s32.totalorder %s69_s29, %s69_s29 }
  0x2b   :  { %p2226_p11 = scmp.ne.s32.totalorder %s69_s29, %s2225_s28  ;;  %p2231_p13 = scmp.lt.s32.totalorder %s2225_s28, %s2225_s28 }
  0x2d   :  { %p2232_p0 = por %p2231_p13, %p2230_p12 }
  0x2f   :  { %p2233_p1 = pnand %p2232_p0, %p2226_p11 }
  0x31   :  { %2236 = shalt.err (!%p2233_p1)
}
  0x32   :  { %74 = dma.hbm_to_vmem [thread:$0]  %s3071_s3, 512, %s69_s29, [#allocation12], %s2450_s23, %s2450_s23, %s2451_s24  }
  0x33   :  { %s2237_s18 = scalar_lea.hbm %s3075_s7, 128 }
  0x34   :  { %p2238_p2 = scmp.ne.s32.totalorder %s3075_s7, %s2237_s18  ;;  %p2241_p3 = scmp.lt.u32.totalorder %s2237_s18, %s3075_s7 }
  0x36   :  { %p2243_p4 = pnand %p2241_p3, %p2238_p2 }
  0x38   :  { %2246 = shalt.err (!%p2243_p4)
}
  0x39   :  { %s2247_s21 = scalar_lea.vmem %s97_s19, 128  ;;  %p2252_p6 = scmp.lt.s32.totalorder %s97_s19, %s97_s19 }
  0x3a   :  { %p2248_p5 = scmp.ne.s32.totalorder %s97_s19, %s2247_s21  ;;  %p2253_p7 = scmp.lt.s32.totalorder %s2247_s21, %s2247_s21 }
  0x3c   :  { %p2254_p8 = por %p2253_p7, %p2252_p6 }
  0x3e   :  { %p2255_p9 = pnand %p2254_p8, %p2248_p5 }
  0x40   :  { %2258 = shalt.err (!%p2255_p9)
}
  0x41   :  { %102 = dma.hbm_to_vmem [thread:$0]  %s3075_s7, 128, %s97_s19, [#allocation15], %s2450_s23, %s2450_s23, %s2451_s24  }
  0x42   :  { %s2454_s22 = smov [#allocation5]   ;;  %s2455_s28 = smov [#allocation10]  }
  0x43   :  { %s37_s2 = sshll.u32 %s2454_s22, 4  ;;  %s59_s0 = sshll.u32 %s2455_s28, 4  ;;  %s38_s2 = int_to_ptr.vmem [resolvable:$true] %s37_s2  ;;  %s60_s0 = int_to_ptr.vmem [resolvable:$true] %s59_s0 }
  0x44   :  { %s3097_s16 = sld [smem:[#allocation30_spill]] }
  0x4a   :  { %s2259_s18 = scalar_lea.hbm %s3097_s16, 128 }
  0x4b   :  { %p2260_p10 = scmp.ne.s32.totalorder %s3097_s16, %s2259_s18  ;;  %p2263_p11 = scmp.lt.u32.totalorder %s2259_s18, %s3097_s16 }
  0x4d   :  { %p2265_p12 = pnand %p2263_p11, %p2260_p10 }
  0x4f   :  { %2268 = shalt.err (!%p2265_p12)
}
  0x50   :  { %s2269_s7 = scalar_lea.vmem %s38_s2, 128  ;;  %p2274_p0 = scmp.lt.s32.totalorder %s38_s2, %s38_s2 }
  0x51   :  { %p2270_p13 = scmp.ne.s32.totalorder %s38_s2, %s2269_s7  ;;  %p2275_p1 = scmp.lt.s32.totalorder %s2269_s7, %s2269_s7 }
  0x53   :  { %p2276_p2 = por %p2275_p1, %p2274_p0 }
  0x55   :  { %p2277_p3 = pnand %p2276_p2, %p2270_p13 }
  0x57   :  { %2280 = shalt.err (!%p2277_p3)
}
  0x58   :  { %40 = dma.hbm_to_vmem [thread:$0]  %s3097_s16, 128, %s38_s2, [#allocation6]  }
  0x59   :  { %s3098_s22 = sld [smem:[#allocation32_spill]] }
  0x5f   :  { %s2281_s28 = scalar_lea.hbm %s3098_s22, 64 }
  0x60   :  { %p2282_p4 = scmp.ne.s32.totalorder %s3098_s22, %s2281_s28  ;;  %p2285_p5 = scmp.lt.u32.totalorder %s2281_s28, %s3098_s22 }
  0x62   :  { %p2287_p6 = pnand %p2285_p5, %p2282_p4 }
  0x64   :  { %2290 = shalt.err (!%p2287_p6)
}
  0x65   :  { %s2291_s30 = scalar_lea.vmem %s60_s0, 64  ;;  %p2296_p8 = scmp.lt.s32.totalorder %s60_s0, %s60_s0 }
  0x66   :  { %p2292_p7 = scmp.ne.s32.totalorder %s60_s0, %s2291_s30  ;;  %p2297_p9 = scmp.lt.s32.totalorder %s2291_s30, %s2291_s30 }
  0x68   :  { %p2298_p10 = por %p2297_p9, %p2296_p8 }
  0x6a   :  { %p2299_p11 = pnand %p2298_p10, %p2292_p7 }
  0x6c   :  { %2302 = shalt.err (!%p2299_p11)
}
  0x6d   :  { %62 = dma.hbm_to_vmem [thread:$0]  %s3098_s22, 64, %s60_s0, [#allocation9]  }
  0x6e   :  { %s2456_s1 = smov [#allocation13]   ;;  %s2457_s7 = smov [#allocation16]  }
  0x6f   :  { %s80_s20 = sshll.u32 %s2456_s1, 4  ;;  %s111_s19 = sshll.u32 %s2457_s7, 4  ;;  %s81_s20 = int_to_ptr.vmem [resolvable:$true] %s80_s20  ;;  %s112_s19 = int_to_ptr.vmem [resolvable:$true] %s111_s19 }
  0x70   :  { %s2303_s29 = scalar_lea.hbm %s3072_s4, 256 }
  0x71   :  { %p2304_p12 = scmp.ne.s32.totalorder %s3072_s4, %s2303_s29  ;;  %p2307_p13 = scmp.lt.u32.totalorder %s2303_s29, %s3072_s4 }
  0x73   :  { %p2309_p0 = pnand %p2307_p13, %p2304_p12 }
  0x75   :  { %2312 = shalt.err (!%p2309_p0)
}
  0x76   :  { %s2313_s0 = scalar_lea.vmem %s81_s20, 256  ;;  %p2318_p2 = scmp.lt.s32.totalorder %s81_s20, %s81_s20 }
  0x77   :  { %p2314_p1 = scmp.ne.s32.totalorder %s81_s20, %s2313_s0  ;;  %p2319_p3 = scmp.lt.s32.totalorder %s2313_s0, %s2313_s0 }
  0x79   :  { %p2320_p4 = por %p2319_p3, %p2318_p2 }
  0x7b   :  { %p2321_p5 = pnand %p2320_p4, %p2314_p1 }
  0x7d   :  { %2324 = shalt.err (!%p2321_p5)
}
  0x7e   :  { %86 = dma.hbm_to_vmem [thread:$0]  %s3072_s4, 256, %s81_s20, [#allocation12], %s2450_s23, %s2450_s23, %s2451_s24  }
  0x7f   :  { %s2325_s16 = scalar_lea.hbm %s3077_s9, 16 }
  0x80   :  { %p2326_p6 = scmp.ne.s32.totalorder %s3077_s9, %s2325_s16  ;;  %p2329_p7 = scmp.lt.u32.totalorder %s2325_s16, %s3077_s9 }
  0x82   :  { %p2331_p8 = pnand %p2329_p7, %p2326_p6 }
  0x84   :  { %2334 = shalt.err (!%p2331_p8)
}
  0x85   :  { %s2335_s29 = scalar_lea.vmem %s112_s19, 16  ;;  %s2339_s28 = scalar_lea.vmem %s112_s19, 32 }
  0x86   :  { %p2336_p9 = scmp.ne.s32.totalorder %s112_s19, %s2335_s29  ;;  %p2340_p10 = scmp.lt.s32.totalorder %s112_s19, %s112_s19 }
  0x87   :  { %p2341_p11 = scmp.lt.s32.totalorder %s2339_s28, %s2335_s29 }
  0x89   :  { %p2342_p12 = por %p2341_p11, %p2340_p10 }
  0x8b   :  { %p2343_p13 = pnand %p2342_p12, %p2336_p9 }
  0x8d   :  { %2346 = shalt.err (!%p2343_p13)
}
  0x8e   :  { %114 = dma.hbm_to_vmem [thread:$0]  %s3077_s9, 16, %s112_s19, [#allocation15]  }
  0x8f   :  { %s2458_s25 = smov [#allocation17]   ;;  %s2347_s22 = scalar_lea.hbm %s3078_s10, 768 }
  0x90   :  { %s120_s26 = sshll.u32 %s2458_s25, 4  ;;  %p2348_p0 = scmp.ne.s32.totalorder %s3078_s10, %s2347_s22  ;;  %s121_s26 = int_to_ptr.vmem [resolvable:$true] %s120_s26 }
  0x91   :  { %p2351_p1 = scmp.lt.u32.totalorder %s2347_s22, %s3078_s10 }
  0x93   :  { %p2353_p2 = pnand %p2351_p1, %p2348_p0 }
  0x95   :  { %2356 = shalt.err (!%p2353_p2)
}
  0x96   :  { %s2357_s1 = scalar_lea.vmem %s121_s26, 768  ;;  %p2362_p4 = scmp.lt.s32.totalorder %s121_s26, %s121_s26 }
  0x97   :  { %p2358_p3 = scmp.ne.s32.totalorder %s121_s26, %s2357_s1  ;;  %p2363_p5 = scmp.lt.s32.totalorder %s2357_s1, %s2357_s1 }
  0x99   :  { %p2364_p6 = por %p2363_p5, %p2362_p4 }
  0x9b   :  { %p2365_p7 = pnand %p2364_p6, %p2358_p3 }
  0x9d   :  { %2368 = shalt.err (!%p2365_p7)
}
  0x9e   :  { %126 = dma.hbm_to_vmem [thread:$0]  %s3078_s10, 768, %s121_s26, [#allocation18], %s2450_s23, %s2450_s23, %s2451_s24  }
  0x9f   :  { %2435 = dma.done.wait [#allocation6], 128  }
  0xa0   :  { %2436 = vsyncadd [#allocation6], 4294967168 }
  0xa1   :  { %2437 = dma.done.wait [#allocation9], 576  }
  0xa2   :  { %2438 = vsyncadd [#allocation9], 4294966720 }
  0xa3   :  { %2439 = dma.done.wait [#allocation12], 768  }
  0xa4   :  { %2440 = vsyncadd [#allocation12], 4294966528 }
  0xa5   :  { %2441 = dma.done.wait [#allocation15], 144  }
  0xa6   :  { %2442 = vsyncadd [#allocation15], 4294967152 }
  0xa7   :  { %2443 = dma.done.wait [#allocation18], 768  }
  0xa8   :  { %2444 = vsyncadd [#allocation18], 4294966528  ;;  %v2459_v0 = vmov 0.0   ;;  %vm2460_vm0 = vmmov 0   ;;  %v2102_v1 = vld [vmem:[#allocation13] sm:$0xff]   ;;  %v2103_v2 = vld [vmem:[#allocation13 + $0x8] sm:$0xff]   ;;  %v231_v7 = vlaneseq }
  0xa9   :  { %1979 = vmatprep.subr.bf16.mxu0 %v2459_v0  ;;  %1983 = vmatprep.mubr.msk.bf16.mxu0 %vm2460_vm0, %v2459_v0  ;;  %v164_v3 = vld [vmem:[#allocation5] sm:$0xff]  ;;  %vm182_vm1 = vcmask 261120   ;;  %v2461_v5 = vmov 1966171168   ;;  %v260_v43 = vld [vmem:[#allocation11] sm:$0xf] }
  0xaa   :  { %1987 = vmatprep.subr.bf16.mxu1 %v2459_v0  ;;  %1989 = vmatprep.mubr.msk.bf16.mxu1 %vm2460_vm0, %v2459_v0  ;;  %v165_v4 = vpack.c.bf16 %v164_v3, %v164_v3  ;;  %v229_v6 = vunpack.c.l.s4 %v2461_v5  ;;  %v2686_v9 = vshrl.u32 %v231_v7, 7  ;;  %v380_v52 = vld [vmem:[%s3073_s5] sm:$0x1]  ;;  %v262_v53 = vld [vmem:[#allocation11 + $0x8] sm:$0xf]  ;;  %vm471_vm2 = vcmask 1041409  }
  0xab   :  { %1980 = vmatpush3.bf16.msra.mxu0 %v2102_v1  ;;  %v261_v54 = vld [vmem:[#allocation11 + $0x4] sm:$0xf]  ;;  %v263_v59 = vld [vmem:[#allocation11 + $0xc] sm:$0xf]  ;;  %v264_v60 = vld [vmem:[#allocation11 + $0x10] sm:$0xf]  ;;  %v381_v3 = vpack.c.bf16 %v380_v52, %v380_v52 }
  0xac   :  { %1981 = vmatprep.subr.bf16.mxu0 %v2459_v0  ;;  %v230_v8 = vunpack.c.0.s8 %v229_v6  ;;  %v2690_v19 = vsub.s32 0, %v2686_v9  ;;  %v265_v1 = vld [vmem:[#allocation11 + $0x14] sm:$0xf]  ;;  %v266_v6 = vld [vmem:[#allocation11 + $0x18] sm:$0xf]  ;;  %vm473_vm3 = vcmask 1042434  }
  0xad   :  { %vm475_vm4 = vcmask 1043459   ;;  %vm477_vm5 = vcmask 1044484   ;;  %vm479_vm6 = vcmask 1045509   ;;  %vm481_vm7 = vcmask 1046534  }
  0xae   :  { %v233_v10 = vsub.s32 %v230_v8, %v2686_v9  ;;  %vm483_vm8 = vcmask 1047559   ;;  %vm486_vm9 = vcmask 64512   ;;  %vm789_vm10 = vcmask 1043456  }
  0xaf   :  { %1982 = vmatpush3.bf16.msra.mxu0 %v2103_v2  ;;  %vm1246_vm11 = vcmask 130048   ;;  %vm1735_vm12 = vcmask 257024   ;;  %vm1737_vm13 = vcmask 7168  }
  0xb0   :  { %1999 = vmatprep.subr.bf16.mxu0 %v2459_v0  ;;  %1739 = vst.msk [vmem:[#allocation4] sm:$0xff] %vm1737_vm13, %v2459_v0 }
  0xb2   :  { %1984 = vmatmul.mubr.msk.bf16.vlgmr.msra.gmra.mrb[0].mxu0 %vm182_vm1, %v165_v4 }
  0xb3   :  { %2001 = vmatprep.mubr.msk.bf16.mxu0 %vm2460_vm0, %v2459_v0 }
 0x185   :  { %v220_v11 = vpop.f32.mrb[0].mxu0 }
 0x186   :  { %v226_v12 = vpack.c.bf16 %v220_v11, %v220_v11  ;;  %v1985_v13 = vpop.f32.mrb[1].mxu0  ;;  %v267_v11 = vld [vmem:[#allocation11 + $0x1c] sm:$0xf] }
 0x187   :  { %v223_v14 = vpop.f32.mrb[2].mxu0 }
 0x188   :  { %v234_v15 = vrot.slane %v226_v12, %v233_v10  ;;  %v1986_v16 = vpop.f32.mrb[3].mxu0 }
 0x18a   :  { %v235_v17 = vcombine.high %v234_v15, %v234_v15  ;;  %v242_v18 = vrot.slane %v234_v15, %v233_v10  ;;  %v383_v15 = vpack.i.b16 %v381_v3, %v381_v3 }
 0x18c   :  { %v249_v20 = vrot.slane %v235_v17, %v233_v10  ;;  %v250_v21 = vcombine.high %v242_v18, %v242_v18  ;;  %v253_v22 = vunpack.i.h.s16 %v242_v18  ;;  %v1895_v23 = vpack.i.b16 %v242_v18, %v242_v18 }
 0x18d   :  { %v388_v17 = vrot.slane %v383_v15, %v2690_v19  ;;  %v2462_v15 = vmov 0  }
 0x18e   :  { %v251_v24 = vcombine.high %v249_v20, %v249_v20  ;;  %v255_v25 = vunpack.i.h.s16 %v249_v20  ;;  %v257_v26 = vunpack.i.h.s16 %v250_v21  ;;  %v269_v27 = vpack.i.b16 %v253_v22, %v253_v22  ;;  %2101 = vset.pattern.permute.xlu0 %v2462_v15  ;;  %2100 = vset.pattern.permute.xlu1 %v2462_v15 }
 0x18f   :  { %v1896_v28 = vpack.i.b16 %v249_v20, %v249_v20  ;;  %v1897_v29 = vpack.i.b16 %v250_v21, %v250_v21  ;;  %v279_v30 = vrot.slane %v1895_v23, %v2690_v19 }
 0x190   :  { %v259_v31 = vunpack.i.h.s16 %v251_v24  ;;  %v271_v32 = vpack.i.b16 %v255_v25, %v255_v25  ;;  %v273_v33 = vpack.i.b16 %v257_v26, %v257_v26  ;;  %v1898_v34 = vpack.i.b16 %v251_v24, %v251_v24 }
 0x191   :  { %v283_v35 = vrot.slane %v269_v27, %v2690_v19  ;;  %v287_v36 = vrot.slane %v1896_v28, %v2690_v19  ;;  %v295_v37 = vrot.slane %v1897_v29, %v2690_v19  ;;  %v309_v38 = vpack.i.b16 %v279_v30, %v279_v30 }
 0x192   :  { %v275_v39 = vpack.i.b16 %v259_v31, %v259_v31  ;;  %v291_v40 = vrot.slane %v271_v32, %v2690_v19  ;;  %v299_v41 = vrot.slane %v273_v33, %v2690_v19  ;;  %v303_v42 = vrot.slane %v1898_v34, %v2690_v19 }
 0x193   :  { %v314_v44 = vrot.slane %v309_v38, %v2690_v19  ;;  %v316_v45 = vpack.i.b16 %v283_v35, %v283_v35  ;;  %v323_v46 = vpack.i.b16 %v287_v36, %v287_v36  ;;  %v337_v47 = vpack.i.b16 %v295_v37, %v295_v37 }
 0x194   :  { %v307_v48 = vrot.slane %v275_v39, %v2690_v19  ;;  %v330_v49 = vpack.i.b16 %v291_v40, %v291_v40  ;;  %v344_v50 = vpack.i.b16 %v299_v41, %v299_v41  ;;  %v351_v51 = vpack.i.b16 %v303_v42, %v303_v42 }
 0x195   :  { %v321_v55 = vrot.slane %v316_v45, %v2690_v19  ;;  %v328_v56 = vrot.slane %v323_v46, %v2690_v19  ;;  %v342_v57 = vrot.slane %v337_v47, %v2690_v19  ;;  %v364_v58 = vadd.bf16 %v314_v44, %v260_v43 }
 0x196   :  { %v335_v61 = vrot.slane %v330_v49, %v2690_v19  ;;  %v349_v62 = vrot.slane %v344_v50, %v2690_v19  ;;  %v358_v63 = vpack.i.b16 %v307_v48, %v307_v48  ;;  %v356_v2 = vrot.slane %v351_v51, %v2690_v19 }
 0x197   :  { %2115 = vtanh.bf16 %v364_v58  ;;  %v366_v4 = vadd.bf16 %v328_v56, %v262_v53  ;;  %v365_v5 = vadd.bf16 %v321_v55, %v261_v54  ;;  %v368_v10 = vadd.bf16 %v342_v57, %v264_v60 }
 0x198   :  { %v367_v8 = vadd.bf16 %v335_v61, %v263_v59  ;;  %v363_v12 = vrot.slane %v358_v63, %v2690_v19  ;;  %v369_v13 = vadd.bf16 %v349_v62, %v265_v1  ;;  %v370_v14 = vadd.bf16 %v356_v2, %v266_v6 }
 0x199   :  { %2117 = vtanh.bf16 %v366_v4  ;;  %v438_v51 = vand.u32 127, %v231_v7 }
 0x19a   :  { %2119 = vtanh.bf16 %v365_v5  ;;  %v371_v16 = vadd.bf16 %v363_v12, %v267_v11 }
 0x19b   :  { %2121 = vtanh.bf16 %v367_v8  ;;  %v2722_v53 = vsub.s32 %v438_v51, %v2686_v9 }
 0x19c   :  { %2123 = vtanh.bf16 %v368_v10 }
 0x19d   :  { %2125 = vtanh.bf16 %v369_v13 }
 0x19e   :  { %2127 = vtanh.bf16 %v370_v14 }
 0x19f   :  { %2129 = vtanh.bf16 %v371_v16  ;;  %v497_v16 = vsub.s32 1, %v2686_v9 }
 0x1a2   :  { %v2116_v18 = vpop.eup %2115 }
 0x1a3   :  { %v389_v20 = vmul.bf16 %v2116_v18, %v388_v17  ;;  %v505_v18 = vsub.s32 3, %v2686_v9 }
 0x1a4   :  { %v2118_v21 = vpop.eup %2117 }
 0x1a5   :  { %v2120_v22 = vpop.eup %2119  ;;  %v397_v23 = vunpack.c.l.bf16 %v389_v20  ;;  %v391_v24 = vmul.bf16 %v2118_v21, %v388_v17 }
 0x1a6   :  { %v2122_v25 = vpop.eup %2121  ;;  %v390_v26 = vmul.bf16 %v2120_v22, %v388_v17 }
 0x1a7   :  { %v2124_v27 = vpop.eup %2123  ;;  %v405_v28 = vsel %vm182_vm1, %v397_v23, 0.0  ;;  %v399_v29 = vunpack.c.l.bf16 %v391_v24  ;;  %v392_v30 = vmul.bf16 %v2122_v25, %v388_v17  ;;  %v509_v24 = vsub.s32 4, %v2686_v9 }
 0x1a8   :  { %v2126_v31 = vpop.eup %2125  ;;  %406 = vadd.xlane.f32.xlu0 %v405_v28  ;;  %v398_v32 = vunpack.c.l.bf16 %v390_v26  ;;  %v393_v33 = vmul.bf16 %v2124_v27, %v388_v17 }
 0x1a9   :  { %v2128_v34 = vpop.eup %2127  ;;  %v411_v35 = vsel %vm182_vm1, %v399_v29, 0.0  ;;  %v400_v36 = vunpack.c.l.bf16 %v392_v30  ;;  %v394_v37 = vmul.bf16 %v2126_v31, %v388_v17  ;;  %v513_v31 = vsub.s32 5, %v2686_v9 }
 0x1aa   :  { %v2130_v38 = vpop.eup %2129  ;;  %412 = vadd.xlane.f32.xlu1 %v411_v35  ;;  %v408_v39 = vsel %vm182_vm1, %v398_v32, 0.0  ;;  %v401_v40 = vunpack.c.l.bf16 %v393_v33  ;;  %v395_v41 = vmul.bf16 %v2128_v34, %v388_v17  ;;  %v517_v35 = vsub.s32 6, %v2686_v9 }
 0x1ab   :  { %v414_v42 = vsel %vm182_vm1, %v400_v36, 0.0  ;;  %v402_v43 = vunpack.c.l.bf16 %v394_v37  ;;  %v396_v44 = vmul.bf16 %v2130_v38, %v388_v17  ;;  %v501_v17 = vsub.s32 2, %v2686_v9 }
 0x1ac   :  { %409 = vadd.xlane.f32.xlu0 %v408_v39  ;;  %v417_v45 = vsel %vm182_vm1, %v401_v40, 0.0  ;;  %v403_v46 = vunpack.c.l.bf16 %v395_v41  ;;  %v521_v39 = vsub.s32 7, %v2686_v9 }
 0x1ad   :  { %v420_v47 = vsel %vm182_vm1, %v402_v43, 0.0  ;;  %v404_v48 = vunpack.c.l.bf16 %v396_v44 }
 0x1ae   :  { %415 = vadd.xlane.f32.xlu1 %v414_v42  ;;  %v423_v49 = vsel %vm182_vm1, %v403_v46, 0.0 }
 0x1af   :  { %v426_v50 = vsel %vm182_vm1, %v404_v48, 0.0 }
 0x1b0   :  { %418 = vadd.xlane.f32.xlu0 %v417_v45 }
 0x1b2   :  { %421 = vadd.xlane.f32.xlu1 %v420_v47 }
 0x1b4   :  { %424 = vadd.xlane.f32.xlu0 %v423_v49 }
 0x1b6   :  { %427 = vadd.xlane.f32.xlu1 %v426_v50 }
 0x235   :  { %v407_v52 = vpop.xlane.xlu0 %406 }
 0x236   :  { %v442_v56 = vrot.slane %v407_v52, %v2722_v53 }
 0x237   :  { %v413_v54 = vpop.xlane.xlu1 %412 }
 0x238   :  { %v450_v58 = vrot.slane %v413_v54, %v2722_v53 }
 0x239   :  { %v410_v55 = vpop.xlane.xlu0 %409 }
 0x23a   :  { %v446_v57 = vrot.slane %v410_v55, %v2722_v53 }
 0x23b   :  { %v416_v59 = vpop.xlane.xlu1 %415 }
 0x23c   :  { %v472_v60 = vsel %vm471_vm2, %v446_v57, %v442_v56  ;;  %v454_v7 = vrot.slane %v416_v59, %v2722_v53 }
 0x23d   :  { %v474_v61 = vsel %vm473_vm3, %v450_v58, %v472_v60  ;;  %v419_v62 = vpop.xlane.xlu0 %418 }
 0x23e   :  { %v476_v63 = vsel %vm475_vm4, %v454_v7, %v474_v61  ;;  %v458_v1 = vrot.slane %v419_v62, %v2722_v53 }
 0x23f   :  { %v422_v2 = vpop.xlane.xlu1 %421 }
 0x240   :  { %v478_v3 = vsel %vm477_vm5, %v458_v1, %v476_v63  ;;  %v462_v4 = vrot.slane %v422_v2, %v2722_v53 }
 0x241   :  { %v425_v5 = vpop.xlane.xlu0 %424 }
 0x242   :  { %v466_v6 = vrot.slane %v425_v5, %v2722_v53  ;;  %v480_v8 = vsel %vm479_vm6, %v462_v4, %v478_v3 }
 0x243   :  { %v428_v10 = vpop.xlane.xlu1 %427 }
 0x244   :  { %v470_v11 = vrot.slane %v428_v10, %v2722_v53  ;;  %v482_v12 = vsel %vm481_vm7, %v466_v6, %v480_v8 }
 0x246   :  { %v484_v13 = vsel %vm483_vm8, %v470_v11, %v482_v12 }
 0x247   :  { %v487_v14 = vsel %vm486_vm9, %v484_v13, -inf }
 0x248   :  { %488 = vmax.xlane.f32.xlu0 %v487_v14 }
 0x2d5   :  { %v489_v20 = vpop.xlane.xlu0 %488 }
 0x2d6   :  { %v494_v21 = vrot.slane %v489_v20, %v2690_v19  ;;  %v498_v22 = vrot.slane %v489_v20, %v497_v16  ;;  %v502_v23 = vrot.slane %v489_v20, %v501_v17  ;;  %v506_v25 = vrot.slane %v489_v20, %v505_v18 }
 0x2d7   :  { %v510_v32 = vrot.slane %v489_v20, %v509_v24  ;;  %v514_v36 = vrot.slane %v489_v20, %v513_v31  ;;  %v518_v40 = vrot.slane %v489_v20, %v517_v35  ;;  %v522_v45 = vrot.slane %v489_v20, %v521_v39 }
 0x2d8   :  { %v531_v26 = vsub.f32 %v407_v52, %v494_v21  ;;  %v532_v27 = vsub.f32 %v410_v55, %v498_v22  ;;  %v533_v28 = vsub.f32 %v413_v54, %v502_v23  ;;  %v534_v33 = vsub.f32 %v416_v59, %v506_v25 }
 0x2d9   :  { %v535_v37 = vsub.f32 %v419_v62, %v510_v32  ;;  %v536_v41 = vsub.f32 %v422_v2, %v514_v36  ;;  %v537_v46 = vsub.f32 %v425_v5, %v518_v40  ;;  %v538_v49 = vsub.f32 %v428_v10, %v522_v45 }
 0x2da   :  { %v539_v29 = vmul.f32 1.442695, %v531_v26  ;;  %v541_v30 = vmul.f32 1.442695, %v532_v27  ;;  %v543_v34 = vmul.f32 1.442695, %v533_v28 }
 0x2db   :  { %v545_v38 = vmul.f32 1.442695, %v534_v33  ;;  %v547_v42 = vmul.f32 1.442695, %v535_v37  ;;  %v549_v47 = vmul.f32 1.442695, %v536_v41 }
 0x2dc   :  { %2131 = vpow2.f32 %v539_v29  ;;  %v551_v50 = vmul.f32 1.442695, %v537_v46  ;;  %v553_v52 = vmul.f32 1.442695, %v538_v49 }
 0x2dd   :  { %2133 = vpow2.f32 %v541_v30 }
 0x2de   :  { %2135 = vpow2.f32 %v543_v34 }
 0x2df   :  { %2137 = vpow2.f32 %v545_v38 }
 0x2e0   :  { %2139 = vpow2.f32 %v547_v42 }
 0x2e1   :  { %2141 = vpow2.f32 %v549_v47 }
 0x2e2   :  { %2143 = vpow2.f32 %v551_v50 }
 0x2e3   :  { %2145 = vpow2.f32 %v553_v52 }
 0x2e6   :  { %v2760_v43 = vpop.eup %2131 }
 0x2e7   :  { %v2762_v44 = vpop.eup %2133  ;;  %564 = vperm.xlu1 %2100, %v2760_v43  }
 0x2e8   :  { %567 = vperm.xlu0 %2101, %v2762_v44   ;;  %v2768_v48 = vpop.eup %2135 }
 0x2e9   :  { %v2771_v51 = vpop.eup %2137 }
 0x2ea   :  { %v2774_v54 = vpop.eup %2139 }
 0x2eb   :  { %570 = vperm.xlu1 %2100, %v2768_v48   ;;  %v2777_v55 = vpop.eup %2141 }
 0x2ec   :  { %v2780_v56 = vpop.eup %2143 }
 0x2ed   :  { %v2783_v57 = vpop.eup %2145 }
 0x2ef   :  { %573 = vperm.xlu1 %2100, %v2771_v51  }
 0x2f3   :  { %576 = vperm.xlu1 %2100, %v2774_v54  }
 0x2f7   :  { %579 = vperm.xlu1 %2100, %v2777_v55  }
 0x2fb   :  { %582 = vperm.xlu1 %2100, %v2780_v56  }
 0x2ff   :  { %585 = vperm.xlu1 %2100, %v2783_v57  }
 0x366   :  { %v565_v58 = vpop.permute.xlu1 %564 }
 0x367   :  { %v568_v61 = vpop.permute.xlu0 %567  ;;  %v590_v1 = vrot.slane %v565_v58, %v2722_v53 }
 0x368   :  { %v594_v63 = vrot.slane %v568_v61, %v2722_v53 }
 0x36a   :  { %v571_v59 = vpop.permute.xlu1 %570  ;;  %v619_v6 = vsel %vm471_vm2, %v594_v63, %v590_v1 }
 0x36b   :  { %v598_v2 = vrot.slane %v571_v59, %v2722_v53 }
 0x36d   :  { %v620_v10 = vsel %vm473_vm3, %v598_v2, %v619_v6 }
 0x36e   :  { %v574_v60 = vpop.permute.xlu1 %573 }
 0x36f   :  { %v602_v3 = vrot.slane %v574_v60, %v2722_v53 }
 0x371   :  { %v621_v12 = vsel %vm475_vm4, %v602_v3, %v620_v10 }
 0x372   :  { %v577_v7 = vpop.permute.xlu1 %576 }
 0x373   :  { %v606_v4 = vrot.slane %v577_v7, %v2722_v53 }
 0x375   :  { %v622_v13 = vsel %vm477_vm5, %v606_v4, %v621_v12  ;;  %v772_v12 = vld [vmem:[#allocation8 + $0x10] sm:$0xf] }
 0x376   :  { %v580_v62 = vpop.permute.xlu1 %579 }
 0x377   :  { %v610_v8 = vrot.slane %v580_v62, %v2722_v53 }
 0x379   :  { %v623_v15 = vsel %vm479_vm6, %v610_v8, %v622_v13 }
 0x37a   :  { %v583_v5 = vpop.permute.xlu1 %582 }
 0x37b   :  { %v614_v11 = vrot.slane %v583_v5, %v2722_v53 }
 0x37d   :  { %v624_v21 = vsel %vm481_vm7, %v614_v11, %v623_v15  ;;  %v771_v11 = vld [vmem:[#allocation8 + $0xc] sm:$0xf] }
 0x37e   :  { %v586_v14 = vpop.permute.xlu1 %585 }
 0x37f   :  { %v618_v20 = vrot.slane %v586_v14, %v2722_v53 }
 0x381   :  { %v625_v22 = vsel %vm483_vm8, %v618_v20, %v624_v21  ;;  %v959_v20 = vsel %vm789_vm10, %v771_v11, 0  ;;  %v1015_v21 = vsel %vm789_vm10, %v772_v12, 0 }
 0x382   :  { %v627_v23 = vsel %vm486_vm9, %v625_v22, 0.0 }
 0x383   :  { %628 = vadd.xlane.f32.xlu1 %v627_v23 }
 0x410   :  { %v629_v25 = vpop.xlane.xlu1 %628 }
 0x411   :  { %v634_v26 = vrot.slane %v629_v25, %v2690_v19  ;;  %v638_v27 = vrot.slane %v629_v25, %v497_v16  ;;  %v642_v28 = vrot.slane %v629_v25, %v501_v17  ;;  %v646_v29 = vrot.slane %v629_v25, %v505_v18 }
 0x412   :  { %v650_v30 = vrot.slane %v629_v25, %v509_v24  ;;  %v654_v19 = vrot.slane %v629_v25, %v513_v31  ;;  %v658_v24 = vrot.slane %v629_v25, %v517_v35  ;;  %v662_v40 = vrot.slane %v629_v25, %v521_v39  ;;  %v768_v35 = vld [vmem:[#allocation8] sm:$0xf] }
 0x413   :  { %2147 = vrcp.f32 %v634_v26  ;;  %v791_v45 = vsel %vm789_vm10, %v768_v35, 0  ;;  %v773_v26 = vld [vmem:[#allocation8 + $0x14] sm:$0xf] }
 0x414   :  { %2149 = vrcp.f32 %v638_v27  ;;  %1988 = vmatpush3.bf16.msra.mxu1 %v791_v45  ;;  %v774_v27 = vld [vmem:[#allocation8 + $0x18] sm:$0xf]  ;;  %v2105_v45 = vld [vmem:[%s3074_s6] sm:$0xff]  }
 0x415   :  { %2151 = vrcp.f32 %v642_v28  ;;  %1993 = vmatprep.subr.bf16.mxu1 %v2459_v0 }
 0x416   :  { %2153 = vrcp.f32 %v646_v29 }
 0x417   :  { %2155 = vrcp.f32 %v650_v30 }
 0x418   :  { %2157 = vrcp.f32 %v654_v19  ;;  %v1127_v19 = vsel %vm789_vm10, %v774_v27, 0 }
 0x419   :  { %2159 = vrcp.f32 %v658_v24  ;;  %v775_v24 = vld [vmem:[#allocation8 + $0x1c] sm:$0xf] }
 0x41a   :  { %2161 = vrcp.f32 %v662_v40  ;;  %v1183_v40 = vsel %vm789_vm10, %v775_v24, 0 }
 0x41d   :  { %v2148_v32 = vpop.eup %2147 }
 0x41e   :  { %v2150_v33 = vpop.eup %2149  ;;  %v2814_v16 = vmul.f32 %v2148_v32, %v2760_v43  ;;  %v1071_v32 = vsel %vm789_vm10, %v773_v26, 0 }
 0x41f   :  { %v2152_v17 = vpop.eup %2151  ;;  %v2817_v34 = vmul.f32 %v2150_v33, %v2762_v44 }
 0x420   :  { %v760_v18 = vpack.c.bf16 %v2814_v16, %v2814_v16  ;;  %v2826_v31 = vmul.f32 %v2152_v17, %v2768_v48  ;;  %v2154_v38 = vpop.eup %2153 }
 0x421   :  { %v761_v37 = vpack.c.bf16 %v2817_v34, %v2817_v34  ;;  %v2833_v43 = vmul.f32 %v2154_v38, %v2771_v51  ;;  %v2156_v44 = vpop.eup %2155  ;;  %v770_v51 = vld [vmem:[#allocation8 + $0x8] sm:$0xf] }
 0x422   :  { %v777_v36 = vunpack.c.l.b16 %v760_v18  ;;  %v762_v42 = vpack.c.bf16 %v2826_v31, %v2826_v31  ;;  %v2840_v39 = vmul.f32 %v2156_v44, %v2774_v54  ;;  %v2158_v47 = vpop.eup %2157  ;;  %v903_v58 = vsel %vm789_vm10, %v770_v51, 0  ;;  %v2104_v44 = vld [vmem:[#allocation14] sm:$0xff]  }
 0x423   :  { %v834_v41 = vunpack.c.l.b16 %v761_v37  ;;  %v763_v9 = vpack.c.bf16 %v2833_v43, %v2833_v43  ;;  %v2845_v50 = vmul.f32 %v2158_v47, %v2777_v55  ;;  %v2160_v52 = vpop.eup %2159  ;;  %2000 = vmatpush3.bf16.msra.mxu0 %v903_v58  ;;  %v2911_v47 = vld [vmem:[#allocation16] ss:$0 sm:$0xff] }
 0x424   :  { %779 = vperm.xlu0 %2101, %v777_v36   ;;  %v890_v46 = vunpack.c.l.b16 %v762_v42  ;;  %v764_v49 = vpack.c.bf16 %v2840_v39, %v2840_v39  ;;  %2011 = vmatprep.subr.bf16.mxu0 %v2459_v0  ;;  %v2852_v60 = vmul.f32 %v2160_v52, %v2780_v56  ;;  %v2162_v7 = vpop.eup %2161  ;;  %v769_v56 = vld [vmem:[#allocation8 + $0x4] sm:$0xf] }
 0x425   :  { %v946_v48 = vunpack.c.l.b16 %v763_v9  ;;  %v765_v54 = vpack.c.bf16 %v2845_v50, %v2845_v50  ;;  %v2857_v62 = vmul.f32 %v2162_v7, %v2783_v57  ;;  %v847_v6 = vsel %vm789_vm10, %v769_v56, 0  ;;  %v1237_v9 = vld [vmem:[#allocation10] sm:$0xf]  ;;  %1398 = vrot.lane.b32.xlu1 %v2911_v47, %s2450_s23 }
 0x426   :  { %v1002_v59 = vunpack.c.l.b16 %v764_v49  ;;  %v766_v55 = vpack.c.bf16 %v2852_v60, %v2852_v60 }
 0x427   :  { %v1058_v61 = vunpack.c.l.b16 %v765_v54  ;;  %v767_v1 = vpack.c.bf16 %v2857_v62, %v2857_v62 }
 0x428   :  { %836 = vperm.xlu0 %2101, %v834_v41   ;;  %v1114_v63 = vunpack.c.l.b16 %v766_v55 }
 0x429   :  { %v1170_v2 = vunpack.c.l.b16 %v767_v1 }
 0x42c   :  { %892 = vperm.xlu0 %2101, %v890_v46   ;;  %v2106_v46 = vld [vmem:[%s3074_s6 + $0x8] sm:$0xff]  }
 0x430   :  { %948 = vperm.xlu0 %2101, %v946_v48  }
 0x434   :  { %1004 = vperm.xlu0 %2101, %v1002_v59  }
 0x438   :  { %1060 = vperm.xlu0 %2101, %v1058_v61  }
 0x43c   :  { %1116 = vperm.xlu0 %2101, %v1114_v63  }
 0x440   :  { %1172 = vperm.xlu0 %2101, %v1170_v2  }
 0x4a3   :  { %v780_v3 = vpop.permute.xlu0 %779 }
 0x4a4   :  { %v784_v4 = vrot.slane %v780_v3, %v2722_v53 }
 0x4a6   :  { %v785_v5 = vpack.c.b16 %v784_v4, %v784_v4 }
 0x4a7   :  { %v837_v8 = vpop.permute.xlu0 %836 }
 0x4a8   :  { %1990 = vmatmul.mubr.msk.bf16.vlgmr.msra.gmra.mrb[0].mxu1 %vm486_vm9, %v785_v5  ;;  %v841_v57 = vrot.slane %v837_v8, %v2722_v53 }
 0x4a9   :  { %1994 = vmatpush3.bf16.msra.mxu1 %v847_v6  ;;  %1995 = vmatprep.mubr.msk.bf16.mxu1 %vm2460_vm0, %v2459_v0 }
 0x4aa   :  { %2005 = vmatprep.subr.bf16.mxu1 %v2459_v0  ;;  %v842_v14 = vpack.c.b16 %v841_v57, %v841_v57 }
 0x4ab   :  { %v893_v10 = vpop.permute.xlu0 %892 }
 0x4ac   :  { %v897_v13 = vrot.slane %v893_v10, %v2722_v53 }
 0x4ae   :  { %v898_v15 = vpack.c.b16 %v897_v13, %v897_v13 }
 0x4af   :  { %v949_v22 = vpop.permute.xlu0 %948 }
 0x4b0   :  { %1996 = vmatmul.mubr.msk.bf16.vlgmr.msra.gmra.mrb[4].mxu1 %vm486_vm9, %v842_v14  ;;  %2002 = vmatmul.mubr.msk.bf16.vlgmr.msra.gmra.mrb[4].mxu0 %vm486_vm9, %v898_v15  ;;  %v953_v23 = vrot.slane %v949_v22, %v2722_v53 }
 0x4b1   :  { %2006 = vmatpush3.bf16.msra.mxu1 %v959_v20  ;;  %2012 = vmatpush3.bf16.msra.mxu0 %v1015_v21 }
 0x4b2   :  { %2007 = vmatprep.mubr.msk.bf16.mxu1 %vm2460_vm0, %v2459_v0  ;;  %2013 = vmatprep.mubr.msk.bf16.mxu0 %vm2460_vm0, %v2459_v0  ;;  %v954_v29 = vpack.c.b16 %v953_v23, %v953_v23 }
 0x4b3   :  { %v1005_v25 = vpop.permute.xlu0 %1004  ;;  %2017 = vmatprep.subr.bf16.mxu1 %v2459_v0  ;;  %2023 = vmatprep.subr.bf16.mxu0 %v2459_v0 }
 0x4b4   :  { %v1009_v28 = vrot.slane %v1005_v25, %v2722_v53 }
 0x4b6   :  { %v1010_v30 = vpack.c.b16 %v1009_v28, %v1009_v28 }
 0x4b7   :  { %v1061_v33 = vpop.permute.xlu0 %1060 }
 0x4b8   :  { %2008 = vmatmul.mubr.msk.bf16.vlgmr.msra.gmra.mrb[8].mxu1 %vm486_vm9, %v954_v29  ;;  %2014 = vmatmul.mubr.msk.bf16.vlgmr.msra.gmra.mrb[8].mxu0 %vm486_vm9, %v1010_v30  ;;  %v1065_v17 = vrot.slane %v1061_v33, %v2722_v53 }
 0x4b9   :  { %2018 = vmatpush3.bf16.msra.mxu1 %v1071_v32  ;;  %2024 = vmatpush3.bf16.msra.mxu0 %v1127_v19 }
 0x4ba   :  { %2019 = vmatprep.mubr.msk.bf16.mxu1 %vm2460_vm0, %v2459_v0  ;;  %2025 = vmatprep.mubr.msk.bf16.mxu0 %vm2460_vm0, %v2459_v0  ;;  %v1066_v37 = vpack.c.b16 %v1065_v17, %v1065_v17 }
 0x4bb   :  { %v1117_v18 = vpop.permute.xlu0 %1116  ;;  %2029 = vmatprep.subr.bf16.mxu1 %v2459_v0  ;;  %2035 = vmatprep.subr.bf16.mxu0 %v2459_v0 }
 0x4bc   :  { %v1121_v36 = vrot.slane %v1117_v18, %v2722_v53 }
 0x4be   :  { %v1122_v38 = vpack.c.b16 %v1121_v36, %v1121_v36 }
 0x4bf   :  { %v1173_v41 = vpop.permute.xlu0 %1172 }
 0x4c0   :  { %2020 = vmatmul.mubr.msk.bf16.vlgmr.msra.gmra.mrb[12].mxu1 %vm486_vm9, %v1066_v37  ;;  %2026 = vmatmul.mubr.msk.bf16.vlgmr.msra.gmra.mrb[12].mxu0 %vm486_vm9, %v1122_v38  ;;  %v1177_v42 = vrot.slane %v1173_v41, %v2722_v53 }
 0x4c1   :  { %2030 = vmatpush3.bf16.msra.mxu1 %v1183_v40  ;;  %2031 = vmatprep.mubr.msk.bf16.mxu1 %vm2460_vm0, %v2459_v0 }
 0x4c2   :  { %2041 = vmatprep.subr.bf16.mxu1 %v2459_v0  ;;  %2037 = vmatprep.mubr.msk.bf16.mxu0 %vm2460_vm0, %v2459_v0  ;;  %v1178_v35 = vpack.c.b16 %v1177_v42, %v1177_v42 }
 0x4c3   :  { %2036 = vmatpush3.bf16.msra.mxu0 %v2104_v44 }
 0x4c4   :  { %2049 = vmatprep.subr.bf16.mxu0 %v2459_v0 }
 0x4c8   :  { %2032 = vmatmul.mubr.msk.bf16.vlgmr.msra.gmra.mrb[16].mxu1 %vm486_vm9, %v1178_v35  ;;  %2038 = vmatmul.mubr.msk.bf16.vlgmr.msra.gmra.mrb[16].mxu0 %vm1246_vm11, %v1237_v9 }
 0x4c9   :  { %2045 = vmatprep.mubr.msk.bf16.mxu1 %vm2460_vm0, %v2459_v0  ;;  %2042 = vmatpush3.bf16.msra.mxu1 %v2105_v45 }
 0x4ca   :  { %2043 = vmatprep.subr.bf16.mxu1 %v2459_v0  ;;  %2053 = vmatprep.mubr.msk.bf16.mxu0 %vm2460_vm0, %v2459_v0 }
 0x4cd   :  { %2044 = vmatpush3.bf16.msra.mxu1 %v2106_v46 }
 0x4ce   :  { %2057 = vmatprep.subr.bf16.mxu1 %v2459_v0 }
 0x57b   :  { %v827_v48 = vpop.f32.mrb[0].mxu1 }
 0x57c   :  { %v1991_v49 = vpop.f32.mrb[1].mxu1  ;;  %v1225_v54 = vpack.c.bf16 %v827_v48, %v827_v48 }
 0x57d   :  { %v830_v51 = vpop.f32.mrb[2].mxu1 }
 0x57e   :  { %v1992_v52 = vpop.f32.mrb[3].mxu1  ;;  %v1298_v6 = vunpack.c.l.b16 %v1225_v54 }
 0x583   :  { %v883_v58 = vpop.f32.mrb[4].mxu1  ;;  %v939_v59 = vpop.f32.mrb[4].mxu0 }
 0x584   :  { %v1226_v7 = vpack.c.bf16 %v883_v58, %v883_v58  ;;  %v1227_v61 = vpack.c.bf16 %v939_v59, %v939_v59  ;;  %v1997_v55 = vpop.f32.mrb[5].mxu1  ;;  %v2003_v63 = vpop.f32.mrb[5].mxu0 }
 0x585   :  { %v886_v1 = vpop.f32.mrb[6].mxu1  ;;  %v942_v2 = vpop.f32.mrb[6].mxu0 }
 0x586   :  { %v1299_v3 = vunpack.c.l.b16 %v1226_v7  ;;  %v1300_v56 = vunpack.c.l.b16 %v1227_v61  ;;  %v1998_v4 = vpop.f32.mrb[7].mxu1  ;;  %v2004_v5 = vpop.f32.mrb[7].mxu0 }
 0x587   :  { %v1912_v4 = vld [vmem:[%s3076_s8] ss:$0 sm:$0xff]  ;;  %s2463_s8 = smov 96  }
 0x588   :  { %v1306_v8 = vrot.slane %v1299_v3, 7  ;;  %v1308_v57 = vrot.slane %v1300_v56, 6 }
 0x58a   :  { %v1307_v10 = vsel %vm471_vm2, %v1306_v8, %v1298_v6 }
 0x58b   :  { %v1309_v11 = vsel %vm473_vm3, %v1308_v57, %v1307_v10  ;;  %v995_v12 = vpop.f32.mrb[8].mxu1  ;;  %v1051_v13 = vpop.f32.mrb[8].mxu0 }
 0x58c   :  { %v1228_v14 = vpack.c.bf16 %v995_v12, %v995_v12  ;;  %v1229_v15 = vpack.c.bf16 %v1051_v13, %v1051_v13  ;;  %v2009_v20 = vpop.f32.mrb[9].mxu1  ;;  %v2015_v21 = vpop.f32.mrb[9].mxu0 }
 0x58d   :  { %v998_v22 = vpop.f32.mrb[10].mxu1  ;;  %v1054_v23 = vpop.f32.mrb[10].mxu0 }
 0x58e   :  { %v1301_v25 = vunpack.c.l.b16 %v1228_v14  ;;  %v1302_v26 = vunpack.c.l.b16 %v1229_v15  ;;  %v2010_v27 = vpop.f32.mrb[11].mxu1  ;;  %v2016_v28 = vpop.f32.mrb[11].mxu0 }
 0x58f   :  { %v1399_v15 = vpop.permute.xlu1 %1398 }
 0x590   :  { %v1310_v29 = vrot.slane %v1301_v25, 5  ;;  %v1312_v30 = vrot.slane %v1302_v26, 4  ;;  %v2107_v25 = vld [vmem:[#allocation17] sm:$0xff]   ;;  %v2108_v26 = vld [vmem:[#allocation17 + $0x8] sm:$0xff]  }
 0x591   :  { %2050 = vmatpush3.bf16.msra.mxu0 %v2107_v25 }
 0x592   :  { %v1311_v32 = vsel %vm475_vm4, %v1310_v29, %v1309_v11  ;;  %2051 = vmatprep.subr.bf16.mxu0 %v2459_v0 }
 0x593   :  { %v1313_v19 = vsel %vm477_vm5, %v1312_v30, %v1311_v32  ;;  %v1107_v33 = vpop.f32.mrb[12].mxu1  ;;  %v1163_v17 = vpop.f32.mrb[12].mxu0  ;;  %v1919_v32 = vld [vmem:[%s3080_s12] ss:$0 sm:$0xff] }
 0x594   :  { %v1230_v18 = vpack.c.bf16 %v1107_v33, %v1107_v33  ;;  %v1231_v24 = vpack.c.bf16 %v1163_v17, %v1163_v17  ;;  %v2021_v36 = vpop.f32.mrb[13].mxu1  ;;  %v2027_v37 = vpop.f32.mrb[13].mxu0  ;;  %v1915_v33 = vld [vmem:[%s3079_s11] ss:$0 sm:$0xff] }
 0x595   :  { %v1110_v38 = vpop.f32.mrb[14].mxu1  ;;  %v1166_v40 = vpop.f32.mrb[14].mxu0  ;;  %2052 = vmatpush3.bf16.msra.mxu0 %v2108_v26 }
 0x596   :  { %v1303_v41 = vunpack.c.l.b16 %v1230_v18  ;;  %v1304_v42 = vunpack.c.l.b16 %v1231_v24  ;;  %v2022_v35 = vpop.f32.mrb[15].mxu1  ;;  %v2028_v44 = vpop.f32.mrb[15].mxu0  ;;  %2065 = vmatprep.subr.bf16.mxu0 %v2459_v0 }
 0x598   :  { %v1314_v45 = vrot.slane %v1303_v41, 3  ;;  %v1316_v46 = vrot.slane %v1304_v42, 2 }
 0x59a   :  { %v1315_v9 = vsel %vm479_vm6, %v1314_v45, %v1313_v19 }
 0x59b   :  { %v1317_v48 = vsel %vm481_vm7, %v1316_v46, %v1315_v9  ;;  %v1219_v49 = vpop.f32.mrb[16].mxu1  ;;  %v1284_v63 = vpop.f32.mrb[16].mxu0 }
 0x59c   :  { %v1232_v51 = vpack.c.bf16 %v1219_v49, %v1219_v49  ;;  %v2033_v52 = vpop.f32.mrb[17].mxu1  ;;  %v2039_v1 = vpop.f32.mrb[17].mxu0  ;;  %v2110_v49 = vld [vmem:[#allocation17 + $0x18] sm:$0xff]  }
 0x59d   :  { %v1222_v58 = vpop.f32.mrb[18].mxu1  ;;  %v1287_v2 = vpop.f32.mrb[18].mxu0  ;;  %v1927_v52 = vld [vmem:[%s3080_s12 + $0x1] ss:$0 sm:$0xff] }
 0x59e   :  { %v1305_v59 = vunpack.c.l.b16 %v1232_v51  ;;  %v2034_v54 = vpop.f32.mrb[19].mxu1  ;;  %v2040_v3 = vpop.f32.mrb[19].mxu0 }
 0x5a0   :  { %v1318_v7 = vrot.slane %v1305_v59, 1 }
 0x5a2   :  { %v1319_v61 = vsel %vm483_vm8, %v1318_v7, %v1317_v48  ;;  %v2109_v48 = vld [vmem:[#allocation17 + $0x10] sm:$0xff]  }
 0x5a3   :  { %v1320_v55 = vpack.c.b16 %v1319_v61, %v1319_v61 }
 0x5a5   :  { %2046 = vmatmul.mubr.msk.bf16.vlgmr.msra.gmra.mrb[20].mxu1 %vm182_vm1, %v1320_v55 }
 0x5a6   :  { %2061 = vmatprep.mubr.msk.bf16.mxu1 %vm2460_vm0, %v2459_v0  ;;  %2058 = vmatpush3.bf16.msra.mxu1 %v2109_v48 }
 0x5a7   :  { %2059 = vmatprep.subr.bf16.mxu1 %v2459_v0 }
 0x5aa   :  { %2060 = vmatpush3.bf16.msra.mxu1 %v2110_v49 }
 0x5ab   :  { %2073 = vmatprep.subr.bf16.mxu1 %v2459_v0 }
 0x678   :  { %v1370_v56 = vpop.f32.mrb[20].mxu1 }
 0x679   :  { %v1371_v5 = vadd.f32 %v1370_v56, %v1284_v63  ;;  %v2047_v6 = vpop.f32.mrb[21].mxu1  ;;  %v1922_v63 = vld [vmem:[%s3079_s11 + $0x1] ss:$0 sm:$0xff] }
 0x67a   :  { %v1373_v8 = vpop.f32.mrb[22].mxu1 }
 0x67b   :  { %v1383_v57 = vadd.f32 %v1912_v4, %v1371_v5  ;;  %v2048_v10 = vpop.f32.mrb[23].mxu1 }
 0x67d   :  { %v1391_v11 = vadd.f32 %v2911_v47, %v1383_v57 }
 0x67f   :  { %v1914_v12 = vmul.f32 -1.442695, %v1391_v11 }
 0x681   :  { %2163 = vpow2.f32 %v1914_v12 }
 0x68b   :  { %v2164_v13 = vpop.eup %2163 }
 0x68c   :  { %v1395_v14 = vadd.f32 1.0, %v2164_v13 }
 0x68e   :  { %2165 = vrcp.f32 %v1395_v14 }
 0x698   :  { %v2166_v20 = vpop.eup %2165 }
 0x699   :  { %v1401_v21 = vmul.f32 %v2166_v20, %v1399_v15  ;;  %v1408_v27 = vsub.f32 1.0, %v2166_v20  ;;  %v2111_v15 = vld [vmem:[#allocation17 + $0x20] sm:$0xff]   ;;  %v2112_v20 = vld [vmem:[#allocation17 + $0x28] sm:$0xff]  }
 0x69b   :  { %1403 = vrot.lane.b32.xlu0 %v1401_v21, %s2450_s23 }
 0x70d   :  { %v1404_v22 = vpop.permute.xlu0 %1403 }
 0x70e   :  { %v1406_v23 = vadd.f32 %v1404_v22, %v1383_v57  ;;  %v1935_v22 = vld [vmem:[%s3080_s12 + $0x2] ss:$0 sm:$0xff] }
 0x710   :  { %2167 = vtanh.f32 %v1406_v23 }
 0x71a   :  { %v2168_v47 = vpop.eup %2167 }
 0x71b   :  { %1410 = vrot.lane.b32.xlu0 %v2168_v47, %s2463_s8 }
 0x78d   :  { %v1411_v28 = vpop.permute.xlu0 %1410 }
 0x78e   :  { %v1413_v29 = vmul.f32 %v1411_v28, %v1408_v27 }
 0x790   :  { %v1414_v30 = vpack.c.bf16 %v1413_v29, %v1413_v29 }
 0x792   :  { %1427 = vrot.lane.b32.xlu0 %v1414_v30, %s2463_s8 }
 0x796   :  { %1498 = vrot.lane.b32.xlu0 %v1919_v32, %s2450_s23 }
 0x804   :  { %v1428_v19 = vpop.permute.xlu0 %1427 }
 0x805   :  { %2054 = vmatmul.mubr.msk.bf16.vlgmr.msra.gmra.mrb[20].mxu0 %vm182_vm1, %v1428_v19 }
 0x806   :  { %2069 = vmatprep.mubr.msk.bf16.mxu0 %vm2460_vm0, %v2459_v0  ;;  %2066 = vmatpush3.bf16.msra.mxu0 %v2111_v15 }
 0x807   :  { %2067 = vmatprep.subr.bf16.mxu0 %v2459_v0 }
 0x808   :  { %v1499_v35 = vpop.permute.xlu0 %1498 }
 0x80a   :  { %2068 = vmatpush3.bf16.msra.mxu0 %v2112_v20 }
 0x8d8   :  { %v1478_v17 = vpop.f32.mrb[20].mxu0 }
 0x8d9   :  { %v1479_v18 = vadd.f32 %v1915_v33, %v1478_v17  ;;  %v2055_v24 = vpop.f32.mrb[21].mxu0 }
 0x8da   :  { %v1481_v36 = vpop.f32.mrb[22].mxu0 }
 0x8db   :  { %v1491_v37 = vadd.f32 %v1919_v32, %v1479_v18  ;;  %v2056_v38 = vpop.f32.mrb[23].mxu0 }
 0x8dd   :  { %v1920_v40 = vmul.f32 -1.442695, %v1491_v37 }
 0x8df   :  { %2169 = vpow2.f32 %v1920_v40 }
 0x8e9   :  { %v2170_v41 = vpop.eup %2169 }
 0x8ea   :  { %v1495_v42 = vadd.f32 1.0, %v2170_v41 }
 0x8ec   :  { %2171 = vrcp.f32 %v1495_v42 }
 0x8f6   :  { %v2172_v44 = vpop.eup %2171 }
 0x8f7   :  { %v1501_v45 = vmul.f32 %v2172_v44, %v1499_v35  ;;  %v1508_v58 = vsub.f32 1.0, %v2172_v44 }
 0x8f9   :  { %1503 = vrot.lane.b32.xlu1 %v1501_v45, %s2450_s23  ;;  %v2113_v45 = vld [vmem:[%s3081_s13] sm:$0xff]  }
 0x96b   :  { %v1504_v46 = vpop.permute.xlu1 %1503 }
 0x96c   :  { %v1506_v9 = vadd.f32 %v1504_v46, %v1479_v18  ;;  %v2114_v46 = vld [vmem:[%s3081_s13 + $0x8] sm:$0xff]  }
 0x96e   :  { %2173 = vtanh.f32 %v1506_v9 }
 0x978   :  { %v2174_v51 = vpop.eup %2173 }
 0x979   :  { %1510 = vrot.lane.b32.xlu0 %v2174_v51, %s2463_s8 }
 0x97d   :  { %1602 = vrot.lane.b32.xlu0 %v1927_v52, %s2450_s23 }
 0x9eb   :  { %v1511_v59 = vpop.permute.xlu0 %1510 }
 0x9ec   :  { %v1513_v54 = vmul.f32 %v1511_v59, %v1508_v58 }
 0x9ee   :  { %v1514_v7 = vadd.f32 %v1513_v54, %v1413_v29  ;;  %v1930_v29 = vld [vmem:[%s3079_s11 + $0x2] ss:$0 sm:$0xff]  ;;  %v2464_v54 = vmov -1e+30  }
 0x9ef   :  { %v1603_v10 = vpop.permute.xlu0 %1602  ;;  %1738 = vst.msk [vmem:[#allocation3] sm:$0xff] %vm1737_vm13, %v2464_v54 }
 0x9f0   :  { %v1515_v61 = vpack.c.bf16 %v1514_v7, %v1514_v7 }
 0x9f2   :  { %1530 = vrot.lane.b32.xlu1 %v1515_v61, %s2463_s8 }
 0xa64   :  { %v1531_v55 = vpop.permute.xlu1 %1530 }
 0xa65   :  { %2062 = vmatmul.mubr.msk.bf16.vlgmr.msra.gmra.mrb[24].mxu1 %vm182_vm1, %v1531_v55 }
 0xa66   :  { %2077 = vmatprep.mubr.msk.bf16.mxu1 %vm2460_vm0, %v2459_v0  ;;  %2074 = vmatpush3.bf16.msra.mxu1 %v2113_v45 }
 0xa67   :  { %2075 = vmatprep.subr.bf16.mxu1 %v2459_v0  ;;  %v1810_v0 = vld [vmem:[#allocation3] sm:$0xff] }
 0xa6a   :  { %2076 = vmatpush3.bf16.msra.mxu1 %v2114_v46 }
 0xb38   :  { %v1581_v1 = vpop.f32.mrb[24].mxu1 }
 0xb39   :  { %v1582_v2 = vadd.f32 %v1922_v63, %v1581_v1  ;;  %v2063_v3 = vpop.f32.mrb[25].mxu1 }
 0xb3a   :  { %v1584_v56 = vpop.f32.mrb[26].mxu1 }
 0xb3b   :  { %v1595_v4 = vadd.f32 %v1927_v52, %v1582_v2  ;;  %v2064_v5 = vpop.f32.mrb[27].mxu1 }
 0xb3d   :  { %v1928_v6 = vmul.f32 -1.442695, %v1595_v4 }
 0xb3f   :  { %2175 = vpow2.f32 %v1928_v6 }
 0xb49   :  { %v2176_v8 = vpop.eup %2175 }
 0xb4a   :  { %v1599_v57 = vadd.f32 1.0, %v2176_v8 }
 0xb4c   :  { %2177 = vrcp.f32 %v1599_v57 }
 0xb56   :  { %v2178_v11 = vpop.eup %2177 }
 0xb57   :  { %v1605_v12 = vmul.f32 %v2178_v11, %v1603_v10  ;;  %v1612_v23 = vsub.f32 1.0, %v2178_v11 }
 0xb59   :  { %1607 = vrot.lane.b32.xlu1 %v1605_v12, %s2450_s23 }
 0xbcb   :  { %v1608_v13 = vpop.permute.xlu1 %1607 }
 0xbcc   :  { %v1610_v14 = vadd.f32 %v1608_v13, %v1582_v2 }
 0xbce   :  { %2179 = vtanh.f32 %v1610_v14 }
 0xbd8   :  { %v2180_v21 = vpop.eup %2179 }
 0xbd9   :  { %1614 = vrot.lane.b32.xlu0 %v2180_v21, %s2463_s8 }
 0xbdd   :  { %1706 = vrot.lane.b32.xlu0 %v1935_v22, %s2450_s23 }
 0xc4b   :  { %v1615_v25 = vpop.permute.xlu0 %1614 }
 0xc4c   :  { %v1617_v26 = vmul.f32 %v1615_v25, %v1612_v23 }
 0xc4e   :  { %v1618_v47 = vadd.f32 %v1617_v26, %v1514_v7  ;;  %v1938_v7 = vld [vmem:[%s3082_s14] ss:$0 sm:$0xff]  ;;  %s2465_s14 = smov [#allocation19]  }
 0xc4f   :  { %v1707_v38 = vpop.permute.xlu0 %1706  ;;  %s1848_s19 = sshll.u32 %s2465_s14, 4  ;;  %s1849_s19 = int_to_ptr.vmem [resolvable:$true] %s1848_s19 }
 0xc50   :  { %v1619_v27 = vpack.c.bf16 %v1618_v47, %v1618_v47  ;;  %s2369_s10 = scalar_lea.vmem %s1849_s19, 64  ;;  %p2374_p9 = scmp.lt.s32.totalorder %s1849_s19, %s1849_s19 }
 0xc51   :  { %p2370_p8 = scmp.ne.s32.totalorder %s1849_s19, %s2369_s10  ;;  %p2375_p10 = scmp.lt.s32.totalorder %s2369_s10, %s2369_s10 }
 0xc52   :  { %1634 = vrot.lane.b32.xlu1 %v1619_v27, %s2463_s8 }
 0xc53   :  { %p2376_p11 = por %p2375_p10, %p2374_p9 }
 0xc55   :  { %p2377_p12 = pnand %p2376_p11, %p2370_p8 }
 0xcc4   :  { %v1635_v28 = vpop.permute.xlu1 %1634 }
 0xcc5   :  { %2070 = vmatmul.mubr.msk.bf16.vlgmr.msra.gmra.mrb[24].mxu0 %vm182_vm1, %v1635_v28 }
 0xd98   :  { %v1685_v30 = vpop.f32.mrb[24].mxu0 }
 0xd99   :  { %v1686_v32 = vadd.f32 %v1930_v29, %v1685_v30  ;;  %v2071_v19 = vpop.f32.mrb[25].mxu0 }
 0xd9a   :  { %v1688_v33 = vpop.f32.mrb[26].mxu0 }
 0xd9b   :  { %v1699_v17 = vadd.f32 %v1935_v22, %v1686_v32  ;;  %v2072_v18 = vpop.f32.mrb[27].mxu0 }
 0xd9d   :  { %v1936_v24 = vmul.f32 -1.442695, %v1699_v17 }
 0xd9f   :  { %2181 = vpow2.f32 %v1936_v24 }
 0xda9   :  { %v2182_v36 = vpop.eup %2181 }
 0xdaa   :  { %v1703_v37 = vadd.f32 1.0, %v2182_v36 }
 0xdac   :  { %2183 = vrcp.f32 %v1703_v37 }
 0xdb6   :  { %v2184_v40 = vpop.eup %2183 }
 0xdb7   :  { %v1709_v41 = vmul.f32 %v2184_v40, %v1707_v38  ;;  %v1716_v9 = vsub.f32 1.0, %v2184_v40 }
 0xdb9   :  { %1711 = vrot.lane.b32.xlu1 %v1709_v41, %s2450_s23 }
 0xe2b   :  { %v1712_v42 = vpop.permute.xlu1 %1711 }
 0xe2c   :  { %v1714_v35 = vadd.f32 %v1712_v42, %v1686_v32 }
 0xe2e   :  { %2185 = vtanh.f32 %v1714_v35 }
 0xe38   :  { %v2186_v44 = vpop.eup %2185 }
 0xe39   :  { %1718 = vrot.lane.b32.xlu0 %v2186_v44, %s2463_s8 }
 0xeab   :  { %v1719_v48 = vpop.permute.xlu0 %1718 }
 0xeac   :  { %v1721_v49 = vmul.f32 %v1719_v48, %v1716_v9 }
 0xeae   :  { %v1722_v51 = vadd.f32 %v1721_v49, %v1618_v47 }
 0xeb0   :  { %v1942_v52 = vpack.c.bf16 %v1722_v51, %v1722_v51 }
 0xeb2   :  { %1732 = vrot.lane.b32.xlu1 %v1942_v52, %s2463_s8 }
 0xf24   :  { %v1733_v58 = vpop.permute.xlu1 %1732 }
 0xf25   :  { %1736 = vst.msk [vmem:[#allocation2] sm:$0xf] %vm1735_vm12, %v1733_v58 }
 0xf2c   :  { %v1740_v59 = vld [vmem:[#allocation2] sm:$0xf] }
 0xf2d   :  { %2078 = vmatmul.mubr.msk.bf16.vlgmr.msra.gmra.mrb[28].mxu1 %vm182_vm1, %v1740_v59 }
0x1000   :  { %v1802_v61 = vpop.f32.mrb[28].mxu1 }
0x1001   :  { %v1803_v55 = vadd.f32 %v1938_v7, %v1802_v61  ;;  %v2079_v63 = vpop.f32.mrb[29].mxu1 }
0x1002   :  { %v1805_v1 = vpop.f32.mrb[30].mxu1 }
0x1003   :  { %1811 = vmax.xlane.f32.xlu0 %v1803_v55  ;;  %v2080_v2 = vpop.f32.mrb[31].mxu1  ;;  %v1808_v3 = vpack.c.bf16 %v1803_v55, %v1803_v55 }
0x1005   :  { %1809 = vst [vmem:[#allocation19] sm:$0xf] %v1808_v3 }
0x1019   :  { %696 = vperm.xlu0 %2101, %v2814_v16  }
0x101d   :  { %702 = vperm.xlu0 %2101, %v2826_v31  }
0x1021   :  { %705 = vperm.xlu0 %2101, %v2833_v43  }
0x1025   :  { %711 = vperm.xlu0 %2101, %v2845_v50  }
0x1029   :  { %717 = vperm.xlu0 %2101, %v2857_v62  }
0x1090   :  { %v1812_v56 = vpop.xlane.xlu0 %1811 }
0x1091   :  { %v1813_v4 = vmax.f32 %v1810_v0, %v1812_v56 }
0x1093   :  { %v1815_v5 = vsub.f32 %v1810_v0, %v1813_v4  ;;  %1832 = vst.msk [vmem:[#allocation3] sm:$0xff] %vm1737_vm13, %v1813_v4  ;;  %1821 = vperm.xlu1 %2100, %v1813_v4  }
0x1097   :  { %699 = vperm.xlu1 %2100, %v2817_v34  }
0x109b   :  { %708 = vperm.xlu1 %2100, %v2840_v39  }
0x1112   :  { %v1822_v16 = vpop.permute.xlu1 %1821 }
0x1113   :  { %v1824_v6 = vsub.f32 %v1803_v55, %v1822_v16 }
0x1115   :  { %v1825_v31 = vmul.f32 1.442695, %v1824_v6 }
0x1117   :  { %2187 = vpow2.f32 %v1825_v31 }
0x1121   :  { %v2188_v43 = vpop.eup %2187 }
0x1122   :  { %1827 = vadd.xlane.f32.xlu1 %v2188_v43 }
0x1133   :  { %714 = vperm.xlu1 %2100, %v2852_v60  }
0x1137   :  { %1724 = vrot.lane.b32.xlu1 %v1721_v49, %s2463_s8 }
0x1138   :  { %2380 = shalt.err (!%p2377_p12)
}
0x1139   :  { %s2381_s7 = scalar_lea.hbm %s3083_s15, 64 }
0x113a   :  { %p2382_p13 = scmp.ne.s32.totalorder %s3083_s15, %s2381_s7  ;;  %p2385_p0 = scmp.lt.u32.totalorder %s2381_s7, %s3083_s15 }
0x113c   :  { %p2387_p1 = pnand %p2385_p0, %p2382_p13 }
0x113e   :  { %2390 = shalt.err (!%p2387_p1)
}
0x113f   :  { %1851 = dma.vmem_to_hbm [thread:$0]  %s1849_s19, 64, %s3083_s15, [#allocation7]   ;;  %v697_v34 = vpop.permute.xlu0 %696  ;;  %v1816_v39 = vmul.f32 1.442695, %v1815_v5  ;;  %v700_v60 = vpop.permute.xlu1 %699  ;;  %v1814_v14 = vld [vmem:[#allocation4] sm:$0xff] }
0x1140   :  { %v726_v62 = vrot.slane %v700_v60, %v2722_v53  ;;  %v722_v57 = vrot.slane %v697_v34, %v2722_v53  ;;  %s2466_s15 = smov [#allocation20]   ;;  %s2467_s20 = smov [#allocation22]  }
0x1141   :  { %2189 = vpow2.f32 %v1816_v39  ;;  %s1860_s4 = sshll.u32 %s2466_s15, 4  ;;  %s1870_s25 = sshll.u32 %s2467_s20, 4  ;;  %s1861_s4 = int_to_ptr.vmem [resolvable:$true] %s1860_s4  ;;  %s3031_s25 = int_to_ptr.vmem [resolvable:$true] %s1870_s25 }
0x1142   :  { %v751_v10 = vsel %vm471_vm2, %v726_v62, %v722_v57  ;;  %s2391_s26 = scalar_lea.vmem %s1861_s4, 128  ;;  %p2396_p3 = scmp.lt.s32.totalorder %s1861_s4, %s1861_s4 }
0x1143   :  { %v703_v50 = vpop.permute.xlu0 %702  ;;  %v709_v13 = vpop.permute.xlu1 %708  ;;  %p2392_p2 = scmp.ne.s32.totalorder %s1861_s4, %s2391_s26  ;;  %p2397_p4 = scmp.lt.s32.totalorder %s2391_s26, %s2391_s26 }
0x1144   :  { %v730_v11 = vrot.slane %v703_v50, %v2722_v53  ;;  %v738_v22 = vrot.slane %v709_v13, %v2722_v53 }
0x1145   :  { %p2398_p5 = por %p2397_p4, %p2396_p3 }
0x1146   :  { %v752_v20 = vsel %vm473_vm3, %v730_v11, %v751_v10 }
0x1147   :  { %v706_v8 = vpop.permute.xlu0 %705  ;;  %p2399_p6 = pnand %p2398_p5, %p2392_p2 }
0x1148   :  { %v734_v21 = vrot.slane %v706_v8, %v2722_v53 }
0x114a   :  { %v753_v25 = vsel %vm475_vm4, %v734_v21, %v752_v20 }
0x114b   :  { %v2190_v12 = vpop.eup %2189  ;;  %v712_v15 = vpop.permute.xlu0 %711  ;;  %v754_v28 = vsel %vm477_vm5, %v738_v22, %v753_v25 }
0x114c   :  { %v1818_v23 = vmul.f32 %v2190_v12, %v1814_v14  ;;  %v742_v29 = vrot.slane %v712_v15, %v2722_v53 }
0x114e   :  { %v755_v33 = vsel %vm479_vm6, %v742_v29, %v754_v28 }
0x114f   :  { %v718_v27 = vpop.permute.xlu0 %717 }
0x1150   :  { %v750_v19 = vrot.slane %v718_v27, %v2722_v53 }
0x11af   :  { %v1828_v26 = vpop.xlane.xlu1 %1827 }
0x11b0   :  { %v1829_v47 = vadd.f32 %v1828_v26, %v1818_v23 }
0x11b2   :  { %1831 = vst.msk [vmem:[#allocation4] sm:$0xff] %vm1737_vm13, %v1829_v47 }
0x11b3   :  { %v715_v30 = vpop.permute.xlu1 %714 }
0x11b4   :  { %v746_v32 = vrot.slane %v715_v30, %v2722_v53 }
0x11b6   :  { %v756_v17 = vsel %vm481_vm7, %v746_v32, %v755_v33 }
0x11b7   :  { %v1725_v18 = vpop.permute.xlu1 %1724  ;;  %v757_v24 = vsel %vm483_vm8, %v750_v19, %v756_v17 }
0x11b8   :  { %1727 = vst.msk [vmem:[#allocation20] sm:$0xff] %vm182_vm1, %v1725_v18 }
0x11b9   :  { %759 = vst.msk [vmem:[#allocation22] sm:$0xff] %vm486_vm9, %v757_v24  ;;  %v1837_v36 = vld [vmem:[#allocation4] sm:$0xff] }
0x11ba   :  { %2402 = shalt.err (!%p2399_p6)
}
0x11bb   :  { %s2403_s22 = scalar_lea.hbm %s3085_s17, 128 }
0x11bc   :  { %p2404_p7 = scmp.ne.s32.totalorder %s3085_s17, %s2403_s22  ;;  %p2407_p8 = scmp.lt.u32.totalorder %s2403_s22, %s3085_s17 }
0x11be   :  { %p2409_p9 = pnand %p2407_p8, %p2404_p7 }
0x11c0   :  { %2412 = shalt.err (!%p2409_p9)
}
0x11c1   :  { %1863 = dma.vmem_to_hbm [thread:$0]  %s1861_s4, 128, %s3085_s17, [#allocation21]   ;;  %2191 = vlog2.f32 %v1837_v36 }
0x11c2   :  { %s2413_s1 = scalar_lea.vmem %s3031_s25, 128  ;;  %p2418_p11 = scmp.lt.s32.totalorder %s3031_s25, %s3031_s25 }
0x11c3   :  { %p2414_p10 = scmp.ne.s32.totalorder %s3031_s25, %s2413_s1  ;;  %p2419_p12 = scmp.lt.s32.totalorder %s2413_s1, %s2413_s1 }
0x11c5   :  { %p2420_p13 = por %p2419_p12, %p2418_p11 }
0x11c7   :  { %p2421_p0 = pnand %p2420_p13, %p2414_p10 }
0x11c9   :  { %2424 = shalt.err (!%p2421_p0)
}
0x11ca   :  { %s3099_s23 = sld [smem:[#allocation34_spill]] }
0x11d0   :  { %s2425_s14 = scalar_lea.hbm %s3099_s23, 128 }
0x11d1   :  { %p2426_p1 = scmp.ne.s32.totalorder %s3099_s23, %s2425_s14  ;;  %p2429_p2 = scmp.lt.u32.totalorder %s2425_s14, %s3099_s23 }
0x11d3   :  { %p2431_p3 = pnand %p2429_p2, %p2426_p1 }
0x11d5   :  { %2434 = shalt.err (!%p2431_p3)
}
0x11d6   :  { %1873 = dma.vmem_to_hbm [thread:$0]  %s3031_s25, 128, %s3099_s23, [#allocation21]   ;;  %v2192_v53 = vpop.eup %2191  ;;  %v1836_v38 = vld [vmem:[#allocation3] sm:$0xff] }
0x11d7   :  { %v1839_v37 = vmul.f32 0.6931472, %v2192_v53  ;;  %s3100_s6 = sld [smem:[#allocation33_spill]] }
0x11d9   :  { %v1840_v40 = vadd.f32 %v1839_v37, %v1836_v38 }
0x11dd   :  { %1841 = vst.msk [vmem:[%s3100_s6] sm:$0xff] %vm1737_vm13, %v1840_v40 }
0x11de   :  { %2445 = dma.done.wait [#allocation7], 64  }
0x11df   :  { %2446 = vsyncadd [#allocation7], 4294967232 }
0x11e0   :  { %2447 = dma.done.wait [#allocation21], 256  }
0x11e1   :  { %2448 = vsyncadd [#allocation21], 4294967040 }
0x11e2   :  { %1885 = vsyncpa [#allocation6], 1 }
0x11e3   :  { %1886 = vsyncpa [#allocation9], 1 }
0x11e4   :  { %1887 = vsyncpa [#allocation12], 1 }
0x11e5   :  { %1888 = vsyncpa [#allocation15], 1 }
0x11e6   :  { %1889 = vsyncpa [#allocation18], 1 }
0x11e7   :  { %1890 = vsyncpa [#allocation7], 1 }
0x11e8   :  { %1891 = vsyncpa [#allocation21], 1 }

</bundles_post_ra>
